<compile_context>
chip_gen: v7x
topology: tpu7x:2x2x1
jax: 0.10.0
libtpu: 0.0.40
codegen_flags: <defaults>
</compile_context>

<pallas_src>
import functools

import jax
import jax.numpy as jnp
import numpy as np
from jax.experimental import pallas as pl
from jax.experimental.pallas import tpu as pltpu

# ---------------- block args (mirrors BlockArgs / GlobalParams) ----------------
INPUT_FILTERS = 8
OUTPUT_FILTERS = 8
EXPAND_RATIO = 4
KERNEL_SIZE = 3
STRIDE = 1          # TODO(synk): stride > 1 (strided depthwise window) not implemented
SE_RATIO = 0.25
ID_SKIP = True
BN_EPS = 1e-3

C_EXP = INPUT_FILTERS * EXPAND_RATIO                 # 32
C_SQ = max(1, int(INPUT_FILTERS * SE_RATIO))         # 2

# rows-array layout (see pack_params)
_R_TAP0 = 0                      # 9 depthwise taps: rows 0..8  (index i*3+j)
_R_B0 = 9                        # BN0 bias (lane-tiled)
_R_B1 = 10                       # BN1 bias (lane-tiled)
_R_FWR0 = 11                     # SE-reduce fold rows (C_SQ of them)
_R_WEG0 = 11 + C_SQ              # SE-expand rows (C_SQ of them)
_R_BEG = 11 + 2 * C_SQ           # SE-expand bias (lane-tiled)
_N_ROWS = _R_BEG + 1             # 16 for C_SQ=2


# ---------------------------- fused Pallas kernel --------------------------------
def _mbconv_kernel(x_ref, we_ref, wp_ref, rows_ref, b2_ref, seb_ref, o_ref,
                   *, bt, h, w, skip):
    """expand(1x1)+BN0+swish -> dw3x3+BN1+swish -> SE -> project(1x1)+BN2 (+skip).

    Lane-folded layout: rows = (image, y), lanes = x*C.  No scratch, no halo.
    """
    cexp, csq = C_EXP, C_SQ
    wc = w * cexp
    m = bt * h
    x2 = x_ref[...].reshape(m, w * INPUT_FILTERS)          # f32, kept for the skip add

    def row(k):                                            # (1, wc) f32 constant row
        return rows_ref[pl.ds(k, 1), :]

    # ---- 1x1 expand conv (block-diagonal bf16 GEMM, BN0 scale folded) + bias + swish --
    a = jnp.dot(x2.astype(jnp.bfloat16), we_ref[...],
                preferred_element_type=jnp.float32)        # (m, wc)
    a = a + row(_R_B0)
    a = a * jax.nn.sigmoid(a)

    # ---- depthwise 3x3, stride 1, SAME: roll + FMA taps (no GEMM, no halo scratch) ----
    row_id = jax.lax.broadcasted_iota(jnp.int32, (m, 1), 0)
    y = (row_id % h) if bt > 1 else row_id                 # per-image row index
    not_top = y != 0
    not_bot = y != (h - 1)
    lane_id = jax.lax.broadcasted_iota(jnp.int32, (1, wc), 1)
    not_left = lane_id >= cexp
    not_right = lane_id < (wc - cexp)

    a_m1 = jnp.where(not_top, pltpu.roll(a, 1, axis=0), 0.0)        # a[y-1, x]
    a_p1 = jnp.where(not_bot, pltpu.roll(a, m - 1, axis=0), 0.0)    # a[y+1, x]

    # per-column-offset bands: bw_j = sum_i a_shift_i * tap[i, j]
    bw0 = a_m1 * row(_R_TAP0 + 0) + a * row(_R_TAP0 + 3) + a_p1 * row(_R_TAP0 + 6)
    bw1 = a_m1 * row(_R_TAP0 + 1) + a * row(_R_TAP0 + 4) + a_p1 * row(_R_TAP0 + 7)
    bw2 = a_m1 * row(_R_TAP0 + 2) + a * row(_R_TAP0 + 5) + a_p1 * row(_R_TAP0 + 8)

    acc = bw1
    acc = acc + jnp.where(not_left, pltpu.roll(bw0, cexp, axis=1), 0.0)       # x-1 tap
    acc = acc + jnp.where(not_right, pltpu.roll(bw2, wc - cexp, axis=1), 0.0)  # x+1 tap

    hh = acc + row(_R_B1)
    hh = hh * jax.nn.sigmoid(hh)                           # (m, wc)

    # ---- squeeze & excite: VPU multiply + cross-lane reduce + broadcast FMA (no MXU) --
    if bt == 1:
        colsum = jnp.sum(hh, axis=0, keepdims=True)        # (1, wc)
    else:
        hh3 = hh.reshape(bt, h, wc)
        colsum = jnp.sum(hh3, axis=1)                      # (bt, wc) per-image pool

    se = row(_R_BEG)                                       # SE-expand bias
    for q in range(csq):
        srq = jnp.sum(colsum * row(_R_FWR0 + q), axis=1, keepdims=True) + seb_ref[q]
        srq = srq * jax.nn.sigmoid(srq)                    # swish, ( {1|bt}, 1 )
        se = se + srq * row(_R_WEG0 + q)
    gate = jax.nn.sigmoid(se)                              # ( {1|bt}, wc )

    if bt == 1:
        hh = hh * gate
    else:
        hh = (hh3 * gate[:, None, :]).reshape(m, wc)

    # ---- 1x1 project conv (block-diagonal bf16 GEMM, BN2 scale folded) + bias + skip --
    out = jnp.dot(hh.astype(jnp.bfloat16), wp_ref[...],
                  preferred_element_type=jnp.float32)      # (m, w*Cout)
    out = out + b2_ref[...]
    if skip:
        out = out + x2                                     # identity skip (drop_connect=None)
    o_ref[...] = out.reshape(bt, h, w * OUTPUT_FILTERS)    # lane-dense store


# ------------------------------ host wrapper ------------------------------------
def _choose_b_tile(n, h):
    """Fold images into the GEMM M dim (target ~128 MXU rows) while keeping >=2
    grid steps so dimension_semantics=('parallel',) feeds both v7x TensorCores."""
    best = 1
    for cand in range(1, n + 1):
        if n % cand:
            continue
        if cand * h > 128:
            break
        if (n // cand) >= 2 or n == 1:
            best = cand
    return best


def mbconv_forward(x_nhwc, packed, *, b_tile=None):
    n, h, w, cin = x_nhwc.shape
    assert cin == INPUT_FILTERS
    assert STRIDE == 1 and KERNEL_SIZE == 3, "only stride-1 3x3 depthwise implemented"
    assert h % 8 == 0, "lane-folded layout needs H % 8 == 0"
    assert (w * cin) % 128 == 0 and (w * C_EXP) % 128 == 0 and \
        (w * OUTPUT_FILTERS) % 128 == 0, "lane-folded layout needs W*C multiples of 128"

    if b_tile is None:
        b_tile = _choose_b_tile(n, h)
    assert n % b_tile == 0

    xf = x_nhwc.reshape(n, h, w * cin)                     # lane-dense, free reshape
    skip = ID_SKIP and STRIDE == 1 and INPUT_FILTERS == OUTPUT_FILTERS
    kern = functools.partial(_mbconv_kernel, bt=b_tile, h=h, w=w, skip=skip)

    consts = (packed["we_bd"], packed["wp_bd"], packed["rows"], packed["b2f"])

    def const_spec(arr):
        nd = arr.ndim
        return pl.BlockSpec(arr.shape, lambda b, _nd=nd: (0,) * _nd)

    out = pl.pallas_call(
        kern,
        out_shape=jax.ShapeDtypeStruct((n, h, w * OUTPUT_FILTERS), jnp.float32),
        grid=(n // b_tile,),
        in_specs=[pl.BlockSpec((b_tile, h, w * cin), lambda b: (b, 0, 0))]
                 + [const_spec(a) for a in consts]
                 + [pl.BlockSpec(memory_space=pltpu.MemorySpace.SMEM)],
        out_specs=pl.BlockSpec((b_tile, h, w * OUTPUT_FILTERS), lambda b: (b, 0, 0)),
        compiler_params=pltpu.CompilerParams(dimension_semantics=("parallel",)),
    )(xf, *consts, packed["se_bias"])
    return out.reshape(n, h, w, OUTPUT_FILTERS)


# --------------------- pack raw params into kernel-friendly form ------------------
def pack_params(p, h, w):
    cin, cexp, cout = INPUT_FILTERS, C_EXP, OUTPUT_FILTERS
    k, csq = KERNEL_SIZE, C_SQ
    s0 = np.asarray(p["bn0_scale"], np.float32).reshape(cexp)
    b0 = np.asarray(p["bn0_bias"], np.float32).reshape(cexp)
    s1 = np.asarray(p["bn1_scale"], np.float32).reshape(cexp)
    b1 = np.asarray(p["bn1_bias"], np.float32).reshape(cexp)
    s2 = np.asarray(p["bn2_scale"], np.float32).reshape(cout)
    b2 = np.asarray(p["bn2_bias"], np.float32).reshape(cout)
    ew = np.asarray(p["expand_w"], np.float32)             # (cin, cexp)
    dw = np.asarray(p["dw_w"], np.float32)                 # (k*k, cexp)
    pw = np.asarray(p["proj_w"], np.float32)               # (cexp, cout)
    ser_w = np.asarray(p["se_r_w"], np.float32)            # (cexp, csq)
    ser_b = np.asarray(p["se_r_b"], np.float32).reshape(csq)
    see_w = np.asarray(p["se_e_w"], np.float32)            # (csq, cexp)
    see_b = np.asarray(p["se_e_b"], np.float32).reshape(cexp)

    # Block-diagonal 1x1-conv weights on the lane-folded layout (BN scales folded),
    # stored bf16 (half the DMA / VMEM); MXU accumulates in f32.
    # TODO(synk): the (W*C)^2 block-diagonal layout does not scale to real EfficientNet
    # W/C sizes -- switch to per-block GEMMs before growing spatial/channel dims.
    we_bd = np.zeros((w * cin, w * cexp), np.float32)
    wp_bd = np.zeros((w * cexp, w * cout), np.float32)
    for x in range(w):
        we_bd[x * cin:(x + 1) * cin, x * cexp:(x + 1) * cexp] = ew * s0[None, :]
        wp_bd[x * cexp:(x + 1) * cexp, x * cout:(x + 1) * cout] = pw * s2[None, :]

    # One consolidated constant-rows array:
    #   rows[0:9]              depthwise taps (i*3+j), BN1 scale folded, lane-tiled
    #   rows[9], rows[10]      BN0 bias, BN1 bias (lane-tiled)
    #   rows[11 : 11+csq]      SE-reduce fold rows (ser_w[:,q]/(h*w), lane-tiled)
    #   rows[11+csq : 11+2csq] SE-expand rows (see_w[q,:], lane-tiled)
    #   rows[11+2*csq]         SE-expand bias (lane-tiled)
    rows = np.zeros((_N_ROWS, w * cexp), np.float32)
    for t in range(k * k):
        rows[_R_TAP0 + t] = np.tile(dw[t] * s1, w)
    rows[_R_B0] = np.tile(b0, w)
    rows[_R_B1] = np.tile(b1, w)
    for q in range(csq):
        rows[_R_FWR0 + q] = np.tile(ser_w[:, q], w) / float(h * w)
        rows[_R_WEG0 + q] = np.tile(see_w[q, :], w)
    rows[_R_BEG] = np.tile(see_b, w)

    return {
        "we_bd": jnp.asarray(we_bd, dtype=jnp.bfloat16),
        "wp_bd": jnp.asarray(wp_bd, dtype=jnp.bfloat16),
        "rows": jnp.asarray(rows),
        "b2f": jnp.asarray(np.tile(b2, w).reshape(1, -1)),
        "se_bias": jnp.asarray(ser_b),                     # (csq,) scalars -> SMEM
    }


# ------------------------- deterministic raw parameters ---------------------------
def init_params(key):
    ks = list(jax.random.split(key, 10))

    def nrm(k, shape, std=0.1):
        return (std * jax.random.normal(k, shape)).astype(jnp.float32)

    def bn_fold(k, c):
        kg, kb, km, kv = jax.random.split(k, 4)
        gamma = 1.0 + 0.1 * jax.random.normal(kg, (c,))
        beta = 0.1 * jax.random.normal(kb, (c,))
        mean = 0.1 * jax.random.normal(km, (c,))
        var = 1.0 + 0.1 * jax.random.uniform(kv, (c,))
        scale = (gamma * jax.lax.rsqrt(var + BN_EPS)).astype(jnp.float32)
        bias = (beta - mean * scale).astype(jnp.float32)
        return scale.reshape(1, c), bias.reshape(1, c)

    p = {}
    p["expand_w"] = nrm(ks[0], (INPUT_FILTERS, C_EXP))          # torch: (C_EXP, Cin, 1, 1)^T
    p["bn0_scale"], p["bn0_bias"] = bn_fold(ks[1], C_EXP)
    p["dw_w"] = nrm(ks[2], (KERNEL_SIZE * KERNEL_SIZE, C_EXP))  # torch: (C_EXP, 1, k, k)
    p["bn1_scale"], p["bn1_bias"] = bn_fold(ks[3], C_EXP)
    p["se_r_w"] = nrm(ks[4], (C_EXP, C_SQ))
    p["se_r_b"] = nrm(ks[5], (1, C_SQ))
    p["se_e_w"] = nrm(ks[6], (C_SQ, C_EXP))
    p["se_e_b"] = nrm(ks[7], (1, C_EXP))
    p["proj_w"] = nrm(ks[8], (C_EXP, OUTPUT_FILTERS))
    p["bn2_scale"], p["bn2_bias"] = bn_fold(ks[9], OUTPUT_FILTERS)
    return p


# ------------------------------ pure-JAX reference --------------------------------
def ref_forward(x, p):
    n, h, w, cin = x.shape
    a = x.reshape(n * h * w, cin) @ p["expand_w"]
    a = a * p["bn0_scale"] + p["bn0_bias"]
    a = a * jax.nn.sigmoid(a)
    a = a.reshape(n, h, w, C_EXP)
    ph = max((h - 1) * STRIDE + KERNEL_SIZE - h, 0)
    pw = max((w - 1) * STRIDE + KERNEL_SIZE - w, 0)
    ap = jnp.pad(a, ((0, 0), (ph // 2, ph - ph // 2), (pw // 2, pw - pw // 2), (0, 0)))
    k = KERNEL_SIZE
    acc = jnp.zeros((n, h, w, C_EXP), jnp.float32)
    for i in range(k):
        for j in range(k):
            acc = acc + ap[:, i:i + h, j:j + w, :] * p["dw_w"][i * k + j]
    hh = acc * p["bn1_scale"] + p["bn1_bias"]
    hh = hh * jax.nn.sigmoid(hh)
    pooled = jnp.mean(hh, axis=(1, 2))
    sr = pooled @ p["se_r_w"] + p["se_r_b"]
    sr = sr * jax.nn.sigmoid(sr)
    se = sr @ p["se_e_w"] + p["se_e_b"]
    hh = hh * jax.nn.sigmoid(se)[:, None, None, :]
    out = hh.reshape(n * h * w, C_EXP) @ p["proj_w"]
    out = out * p["bn2_scale"] + p["bn2_bias"]
    out = out.reshape(n, h, w, OUTPUT_FILTERS)
    if ID_SKIP and STRIDE == 1 and INPUT_FILTERS == OUTPUT_FILTERS:
        out = out + x
    return out


# ------------------------------------ main ----------------------------------------
if __name__ == "__main__":
    key = jax.random.PRNGKey(0)
    kx, kp = jax.random.split(key)

    # PyTorch-style NCHW input, transposed to NHWC at the boundary.
    x_nchw = jax.random.normal(kx, (2, INPUT_FILTERS, 16, 16), dtype=jnp.float32)
    x_nhwc = jnp.transpose(x_nchw, (0, 2, 3, 1))

    params = init_params(kp)
    packed = pack_params(params, h=16, w=16)

    out = mbconv_forward(x_nhwc, packed)
    out = jax.block_until_ready(out)

    ref = ref_forward(x_nhwc, params)
    np.testing.assert_allclose(np.asarray(out), np.asarray(ref), rtol=2e-2, atol=2e-2)

    print("KERNEL_OK")
</pallas_src>

<mosaic_0001>
module attributes {stable_mosaic.version = 11 : i64} {
  func.func @_mbconv_kernel(%arg0: i32, %arg1: memref<1x16x128xf32, #tpu.memory_space<vmem>>, %arg2: memref<128x512xbf16, #tpu.memory_space<vmem>>, %arg3: memref<512x128xbf16, #tpu.memory_space<vmem>>, %arg4: memref<16x512xf32, #tpu.memory_space<vmem>>, %arg5: memref<1x128xf32, #tpu.memory_space<vmem>>, %arg6: memref<2xf32, #tpu.memory_space<smem>>, %arg7: memref<1x16x128xf32, #tpu.memory_space<vmem>>) attributes {dimension_semantics = [#tpu.dimension_semantics<parallel>], iteration_bounds = array<i64: 2>, scalar_prefetch = 0 : i64, scratch_operands = 0 : i64, tpu.core_type = #tpu.core_type<tc>, window_params = [{transform_indices = @transform_0, window_bounds = array<i64: 1, 16, 128>}, {pipeline_mode = #tpu.pipeline_mode<synchronous>, transform_indices = @transform_1, window_bounds = array<i64: 128, 512>}, {pipeline_mode = #tpu.pipeline_mode<synchronous>, transform_indices = @transform_2, window_bounds = array<i64: 512, 128>}, {pipeline_mode = #tpu.pipeline_mode<synchronous>, transform_indices = @transform_3, window_bounds = array<i64: 16, 512>}, {pipeline_mode = #tpu.pipeline_mode<synchronous>, transform_indices = @transform_4, window_bounds = array<i64: 1, 128>}, {transform_indices = @transform_5, window_bounds = array<i64: 2>}, {transform_indices = @transform_6, window_bounds = array<i64: 1, 16, 128>}]} {
    %c0 = arith.constant 0 : index
    %c0_0 = arith.constant 0 : index
    %c0_1 = arith.constant 0 : index
    %0 = vector.load %arg1[%c0, %c0_0, %c0_1] : memref<1x16x128xf32, #tpu.memory_space<vmem>>, vector<1x16x128xf32>
    %1 = vector.shape_cast %0 : vector<1x16x128xf32> to vector<16x128xf32>
    %2 = arith.truncf %1 : vector<16x128xf32> to vector<16x128xbf16>
    %c0_2 = arith.constant 0 : index
    %c0_3 = arith.constant 0 : index
    %3 = vector.load %arg2[%c0_2, %c0_3] : memref<128x512xbf16, #tpu.memory_space<vmem>>, vector<128x512xbf16>
    %cst = arith.constant dense<0.000000e+00> : vector<16x512xf32>
    %4 = tpu.matmul %2, %3, %cst {dimension_numbers = #tpu.dot_dimension_numbers<[1], [0], [0], [1], [0, 0, 1, 1], [], []>} : vector<16x128xbf16>, vector<128x512xbf16>, vector<16x512xf32> -> vector<16x512xf32>
    %c9 = arith.constant 9 : index
    %c0_4 = arith.constant 0 : index
    %5 = vector.load %arg4[%c9, %c0_4] : memref<16x512xf32, #tpu.memory_space<vmem>>, vector<1x512xf32>
    %6 = vector.broadcast %5 : vector<1x512xf32> to vector<16x512xf32>
    %7 = arith.addf %4, %6 : vector<16x512xf32>
    %8 = arith.negf %7 : vector<16x512xf32>
    %9 = math.exp %8 : vector<16x512xf32>
    %cst_5 = arith.constant 1.000000e+00 : f32
    %10 = vector.broadcast %cst_5 : f32 to vector<16x512xf32>
    %11 = arith.addf %10, %9 : vector<16x512xf32>
    %12 = arith.divf %10, %11 : vector<16x512xf32>
    %13 = arith.mulf %7, %12 : vector<16x512xf32>
    %14 = tpu.iota {dimensions = array<i32: 0>} : vector<16x1xi32>
    %c0_i32 = arith.constant 0 : i32
    %15 = vector.broadcast %c0_i32 : i32 to vector<16x1xi32>
    %16 = arith.cmpi ne, %14, %15 : vector<16x1xi32>
    %c15_i32 = arith.constant 15 : i32
    %17 = vector.broadcast %c15_i32 : i32 to vector<16x1xi32>
    %18 = arith.cmpi ne, %14, %17 : vector<16x1xi32>
    %19 = tpu.iota {dimensions = array<i32: 1>} : vector<1x512xi32>
    %c32_i32 = arith.constant 32 : i32
    %20 = vector.broadcast %c32_i32 : i32 to vector<1x512xi32>
    %21 = arith.cmpi sge, %19, %20 : vector<1x512xi32>
    %c480_i32 = arith.constant 480 : i32
    %22 = vector.broadcast %c480_i32 : i32 to vector<1x512xi32>
    %23 = arith.cmpi slt, %19, %22 : vector<1x512xi32>
    %c1_i32 = arith.constant 1 : i32
    %24 = tpu.dynamic_rotate %13 by %c1_i32 dim 0 : vector<16x512xf32>, i32 -> vector<16x512xf32>
    %cst_6 = arith.constant 0.000000e+00 : f32
    %25 = vector.shape_cast %16 : vector<16x1xi1> to vector<16x1xi1>
    %26 = vector.broadcast %25 : vector<16x1xi1> to vector<16x512xi1>
    %27 = vector.broadcast %cst_6 : f32 to vector<16x512xf32>
    %28 = arith.select %26, %24, %27 : vector<16x512xi1>, vector<16x512xf32>
    %c15_i32_7 = arith.constant 15 : i32
    %29 = tpu.dynamic_rotate %13 by %c15_i32_7 dim 0 : vector<16x512xf32>, i32 -> vector<16x512xf32>
    %cst_8 = arith.constant 0.000000e+00 : f32
    %30 = vector.shape_cast %18 : vector<16x1xi1> to vector<16x1xi1>
    %31 = vector.broadcast %30 : vector<16x1xi1> to vector<16x512xi1>
    %32 = vector.broadcast %cst_8 : f32 to vector<16x512xf32>
    %33 = arith.select %31, %29, %32 : vector<16x512xi1>, vector<16x512xf32>
    %c0_9 = arith.constant 0 : index
    %c0_10 = arith.constant 0 : index
    %34 = vector.load %arg4[%c0_9, %c0_10] : memref<16x512xf32, #tpu.memory_space<vmem>>, vector<1x512xf32>
    %35 = vector.broadcast %34 : vector<1x512xf32> to vector<16x512xf32>
    %36 = arith.mulf %28, %35 : vector<16x512xf32>
    %c3 = arith.constant 3 : index
    %c0_11 = arith.constant 0 : index
    %37 = vector.load %arg4[%c3, %c0_11] : memref<16x512xf32, #tpu.memory_space<vmem>>, vector<1x512xf32>
    %38 = vector.broadcast %37 : vector<1x512xf32> to vector<16x512xf32>
    %39 = arith.mulf %13, %38 : vector<16x512xf32>
    %40 = arith.addf %36, %39 : vector<16x512xf32>
    %c6 = arith.constant 6 : index
    %c0_12 = arith.constant 0 : index
    %41 = vector.load %arg4[%c6, %c0_12] : memref<16x512xf32, #tpu.memory_space<vmem>>, vector<1x512xf32>
    %42 = vector.broadcast %41 : vector<1x512xf32> to vector<16x512xf32>
    %43 = arith.mulf %33, %42 : vector<16x512xf32>
    %44 = arith.addf %40, %43 : vector<16x512xf32>
    %c1 = arith.constant 1 : index
    %c0_13 = arith.constant 0 : index
    %45 = vector.load %arg4[%c1, %c0_13] : memref<16x512xf32, #tpu.memory_space<vmem>>, vector<1x512xf32>
    %46 = vector.broadcast %45 : vector<1x512xf32> to vector<16x512xf32>
    %47 = arith.mulf %28, %46 : vector<16x512xf32>
    %c4 = arith.constant 4 : index
    %c0_14 = arith.constant 0 : index
    %48 = vector.load %arg4[%c4, %c0_14] : memref<16x512xf32, #tpu.memory_space<vmem>>, vector<1x512xf32>
    %49 = vector.broadcast %48 : vector<1x512xf32> to vector<16x512xf32>
    %50 = arith.mulf %13, %49 : vector<16x512xf32>
    %51 = arith.addf %47, %50 : vector<16x512xf32>
    %c7 = arith.constant 7 : index
    %c0_15 = arith.constant 0 : index
    %52 = vector.load %arg4[%c7, %c0_15] : memref<16x512xf32, #tpu.memory_space<vmem>>, vector<1x512xf32>
    %53 = vector.broadcast %52 : vector<1x512xf32> to vector<16x512xf32>
    %54 = arith.mulf %33, %53 : vector<16x512xf32>
    %55 = arith.addf %51, %54 : vector<16x512xf32>
    %c2 = arith.constant 2 : index
    %c0_16 = arith.constant 0 : index
    %56 = vector.load %arg4[%c2, %c0_16] : memref<16x512xf32, #tpu.memory_space<vmem>>, vector<1x512xf32>
    %57 = vector.broadcast %56 : vector<1x512xf32> to vector<16x512xf32>
    %58 = arith.mulf %28, %57 : vector<16x512xf32>
    %c5 = arith.constant 5 : index
    %c0_17 = arith.constant 0 : index
    %59 = vector.load %arg4[%c5, %c0_17] : memref<16x512xf32, #tpu.memory_space<vmem>>, vector<1x512xf32>
    %60 = vector.broadcast %59 : vector<1x512xf32> to vector<16x512xf32>
    %61 = arith.mulf %13, %60 : vector<16x512xf32>
    %62 = arith.addf %58, %61 : vector<16x512xf32>
    %c8 = arith.constant 8 : index
    %c0_18 = arith.constant 0 : index
    %63 = vector.load %arg4[%c8, %c0_18] : memref<16x512xf32, #tpu.memory_space<vmem>>, vector<1x512xf32>
    %64 = vector.broadcast %63 : vector<1x512xf32> to vector<16x512xf32>
    %65 = arith.mulf %33, %64 : vector<16x512xf32>
    %66 = arith.addf %62, %65 : vector<16x512xf32>
    %c32_i32_19 = arith.constant 32 : i32
    %67 = tpu.dynamic_rotate %44 by %c32_i32_19 dim 1 : vector<16x512xf32>, i32 -> vector<16x512xf32>
    %cst_20 = arith.constant 0.000000e+00 : f32
    %68 = vector.shape_cast %21 : vector<1x512xi1> to vector<1x512xi1>
    %69 = vector.broadcast %68 : vector<1x512xi1> to vector<16x512xi1>
    %70 = vector.broadcast %cst_20 : f32 to vector<16x512xf32>
    %71 = arith.select %69, %67, %70 : vector<16x512xi1>, vector<16x512xf32>
    %72 = arith.addf %55, %71 : vector<16x512xf32>
    %c480_i32_21 = arith.constant 480 : i32
    %73 = tpu.dynamic_rotate %66 by %c480_i32_21 dim 1 : vector<16x512xf32>, i32 -> vector<16x512xf32>
    %cst_22 = arith.constant 0.000000e+00 : f32
    %74 = vector.shape_cast %23 : vector<1x512xi1> to vector<1x512xi1>
    %75 = vector.broadcast %74 : vector<1x512xi1> to vector<16x512xi1>
    %76 = vector.broadcast %cst_22 : f32 to vector<16x512xf32>
    %77 = arith.select %75, %73, %76 : vector<16x512xi1>, vector<16x512xf32>
    %78 = arith.addf %72, %77 : vector<16x512xf32>
    %c10 = arith.constant 10 : index
    %c0_23 = arith.constant 0 : index
    %79 = vector.load %arg4[%c10, %c0_23] : memref<16x512xf32, #tpu.memory_space<vmem>>, vector<1x512xf32>
    %80 = vector.broadcast %79 : vector<1x512xf32> to vector<16x512xf32>
    %81 = arith.addf %78, %80 : vector<16x512xf32>
    %82 = arith.negf %81 : vector<16x512xf32>
    %83 = math.exp %82 : vector<16x512xf32>
    %cst_24 = arith.constant 1.000000e+00 : f32
    %84 = vector.broadcast %cst_24 : f32 to vector<16x512xf32>
    %85 = arith.addf %84, %83 : vector<16x512xf32>
    %86 = arith.divf %84, %85 : vector<16x512xf32>
    %87 = arith.mulf %81, %86 : vector<16x512xf32>
    %cst_25 = arith.constant dense<0.000000e+00> : vector<512xf32>
    %88 = vector.multi_reduction <add>, %87, %cst_25 [0] : vector<16x512xf32> to vector<512xf32>
    %89 = vector.shape_cast %88 : vector<512xf32> to vector<1x512xf32>
    %c15 = arith.constant 15 : index
    %c0_26 = arith.constant 0 : index
    %90 = vector.load %arg4[%c15, %c0_26] : memref<16x512xf32, #tpu.memory_space<vmem>>, vector<1x512xf32>
    %c11 = arith.constant 11 : index
    %c0_27 = arith.constant 0 : index
    %91 = vector.load %arg4[%c11, %c0_27] : memref<16x512xf32, #tpu.memory_space<vmem>>, vector<1x512xf32>
    %92 = arith.mulf %89, %91 : vector<1x512xf32>
    %cst_28 = arith.constant dense<0.000000e+00> : vector<1xf32>
    %93 = vector.multi_reduction <add>, %92, %cst_28 [1] : vector<1x512xf32> to vector<1xf32>
    %94 = vector.shape_cast %93 : vector<1xf32> to vector<1x1xf32>
    %c0_29 = arith.constant 0 : index
    %95 = memref.load %arg6[%c0_29] : memref<2xf32, #tpu.memory_space<smem>>
    %96 = vector.broadcast %95 : f32 to vector<1x1xf32>
    %97 = arith.addf %94, %96 : vector<1x1xf32>
    %98 = arith.negf %97 : vector<1x1xf32>
    %99 = math.exp %98 : vector<1x1xf32>
    %cst_30 = arith.constant 1.000000e+00 : f32
    %100 = vector.broadcast %cst_30 : f32 to vector<1x1xf32>
    %101 = arith.addf %100, %99 : vector<1x1xf32>
    %102 = arith.divf %100, %101 : vector<1x1xf32>
    %103 = arith.mulf %97, %102 : vector<1x1xf32>
    %c13 = arith.constant 13 : index
    %c0_31 = arith.constant 0 : index
    %104 = vector.load %arg4[%c13, %c0_31] : memref<16x512xf32, #tpu.memory_space<vmem>>, vector<1x512xf32>
    %105 = vector.broadcast %103 : vector<1x1xf32> to vector<1x512xf32>
    %106 = arith.mulf %105, %104 : vector<1x512xf32>
    %107 = arith.addf %90, %106 : vector<1x512xf32>
    %c12 = arith.constant 12 : index
    %c0_32 = arith.constant 0 : index
    %108 = vector.load %arg4[%c12, %c0_32] : memref<16x512xf32, #tpu.memory_space<vmem>>, vector<1x512xf32>
    %109 = arith.mulf %89, %108 : vector<1x512xf32>
    %cst_33 = arith.constant dense<0.000000e+00> : vector<1xf32>
    %110 = vector.multi_reduction <add>, %109, %cst_33 [1] : vector<1x512xf32> to vector<1xf32>
    %111 = vector.shape_cast %110 : vector<1xf32> to vector<1x1xf32>
    %c1_34 = arith.constant 1 : index
    %112 = memref.load %arg6[%c1_34] : memref<2xf32, #tpu.memory_space<smem>>
    %113 = vector.broadcast %112 : f32 to vector<1x1xf32>
    %114 = arith.addf %111, %113 : vector<1x1xf32>
    %115 = arith.negf %114 : vector<1x1xf32>
    %116 = math.exp %115 : vector<1x1xf32>
    %cst_35 = arith.constant 1.000000e+00 : f32
    %117 = vector.broadcast %cst_35 : f32 to vector<1x1xf32>
    %118 = arith.addf %117, %116 : vector<1x1xf32>
    %119 = arith.divf %117, %118 : vector<1x1xf32>
    %120 = arith.mulf %114, %119 : vector<1x1xf32>
    %c14 = arith.constant 14 : index
    %c0_36 = arith.constant 0 : index
    %121 = vector.load %arg4[%c14, %c0_36] : memref<16x512xf32, #tpu.memory_space<vmem>>, vector<1x512xf32>
    %122 = vector.broadcast %120 : vector<1x1xf32> to vector<1x512xf32>
    %123 = arith.mulf %122, %121 : vector<1x512xf32>
    %124 = arith.addf %107, %123 : vector<1x512xf32>
    %125 = arith.negf %124 : vector<1x512xf32>
    %126 = math.exp %125 : vector<1x512xf32>
    %cst_37 = arith.constant 1.000000e+00 : f32
    %127 = vector.broadcast %cst_37 : f32 to vector<1x512xf32>
    %128 = arith.addf %127, %126 : vector<1x512xf32>
    %129 = arith.divf %127, %128 : vector<1x512xf32>
    %130 = vector.broadcast %129 : vector<1x512xf32> to vector<16x512xf32>
    %131 = arith.mulf %87, %130 : vector<16x512xf32>
    %132 = arith.truncf %131 : vector<16x512xf32> to vector<16x512xbf16>
    %c0_38 = arith.constant 0 : index
    %c0_39 = arith.constant 0 : index
    %133 = vector.load %arg3[%c0_38, %c0_39] : memref<512x128xbf16, #tpu.memory_space<vmem>>, vector<512x128xbf16>
    %cst_40 = arith.constant dense<0.000000e+00> : vector<16x128xf32>
    %134 = tpu.matmul %132, %133, %cst_40 {dimension_numbers = #tpu.dot_dimension_numbers<[1], [0], [0], [1], [0, 0, 1, 1], [], []>} : vector<16x512xbf16>, vector<512x128xbf16>, vector<16x128xf32> -> vector<16x128xf32>
    %c0_41 = arith.constant 0 : index
    %c0_42 = arith.constant 0 : index
    %135 = vector.load %arg5[%c0_41, %c0_42] : memref<1x128xf32, #tpu.memory_space<vmem>>, vector<1x128xf32>
    %136 = vector.broadcast %135 : vector<1x128xf32> to vector<16x128xf32>
    %137 = arith.addf %134, %136 : vector<16x128xf32>
    %138 = arith.addf %137, %1 : vector<16x128xf32>
    %139 = vector.shape_cast %138 : vector<16x128xf32> to vector<1x16x128xf32>
    %c0_43 = arith.constant 0 : index
    %c0_44 = arith.constant 0 : index
    %c0_45 = arith.constant 0 : index
    %140 = vector.load %arg7[%c0_43, %c0_44, %c0_45] : memref<1x16x128xf32, #tpu.memory_space<vmem>>, vector<1x16x128xf32>
    tpu.vector_store %arg7[%c0_43, %c0_44, %c0_45], %139 {strides = array<i32>} : memref<1x16x128xf32, #tpu.memory_space<vmem>>, vector<1x16x128xf32>,
    return
  }
  func.func @transform_0(%arg0: i32) -> (i32, i32, i32) {
    %c0_i32 = arith.constant 0 : i32
    %c0_i32_0 = arith.constant 0 : i32
    %c0_i32_1 = arith.constant 0 : i32
    return %arg0, %c0_i32, %c0_i32_0 : i32, i32, i32
  }
  func.func @transform_1(%arg0: i32) -> (i32, i32) {
    %c0_i32 = arith.constant 0 : i32
    %c0_i32_0 = arith.constant 0 : i32
    %c0_i32_1 = arith.constant 0 : i32
    return %c0_i32, %c0_i32_0 : i32, i32
  }
  func.func @transform_2(%arg0: i32) -> (i32, i32) {
    %c0_i32 = arith.constant 0 : i32
    %c0_i32_0 = arith.constant 0 : i32
    %c0_i32_1 = arith.constant 0 : i32
    return %c0_i32, %c0_i32_0 : i32, i32
  }
  func.func @transform_3(%arg0: i32) -> (i32, i32) {
    %c0_i32 = arith.constant 0 : i32
    %c0_i32_0 = arith.constant 0 : i32
    %c0_i32_1 = arith.constant 0 : i32
    return %c0_i32, %c0_i32_0 : i32, i32
  }
  func.func @transform_4(%arg0: i32) -> (i32, i32) {
    %c0_i32 = arith.constant 0 : i32
    %c0_i32_0 = arith.constant 0 : i32
    %c0_i32_1 = arith.constant 0 : i32
    return %c0_i32, %c0_i32_0 : i32, i32
  }
  func.func @transform_5(%arg0: i32) -> i32 {
    %c0_i32 = arith.constant 0 : i32
    %c0_i32_0 = arith.constant 0 : i32
    return %c0_i32 : i32
  }
  func.func @transform_6(%arg0: i32) -> (i32, i32, i32) {
    %c0_i32 = arith.constant 0 : i32
    %c0_i32_0 = arith.constant 0 : i32
    %c0_i32_1 = arith.constant 0 : i32
    return %arg0, %c0_i32, %c0_i32_0 : i32, i32, i32
  }
}

</mosaic_0001>

<bundles_post_ra>
// kernel: tpu_custom_call.1
= control target key start
LH: loop header
LB: loop body
LE: loop exit
PB: predicated region body
PF: predicated region fallthrough
CT: control target
= control target key end

     0   :  { %s3569_s0 = inlined_call_operand.hbm [shape: f32[2,16,128], index: 0, kind: input, shape index: {}]   ;;  %s3570_s1 = inlined_call_operand.hbm [shape: bf16[128,512], index: 1, kind: input, shape index: {}]   ;;  %s3571_s2 = inlined_call_operand.hbm [shape: bf16[512,128], index: 2, kind: input, shape index: {}]   ;;  %s3572_s3 = inlined_call_operand.hbm [shape: f32[16,512], index: 3, kind: input, shape index: {}]   ;;  %s3573_s4 = inlined_call_operand.vmem [shape: f32[1,128], index: 4, kind: input, shape index: {}]   ;;  %s3574_s5 = inlined_call_operand.vmem [shape: f32[2], index: 5, kind: input, shape index: {}]   ;;  %s3575_s6 = inlined_call_operand.hbm [shape: f32[2,16,128], index: 6, kind: output, shape index: {}]  }
   0x1   :  { %3598 = sst [smem:[#allocation34_spill]] %s3570_s1 }
   0x2   :  { %11 = vsyncpa [#allocation3], 0 }
   0x3   :  { %13 = vsyncpa [#allocation3 + $0x1], 0 }
   0x4   :  { %14 = vsyncpa [#allocation7], 0 }
   0x5   :  { %15 = vsyncpa [#allocation10], 0 }
   0x6   :  { %16 = vsyncpa [#allocation5], 0 }
   0x7   :  { %17 = vsyncpa [#allocation4], 0 }
   0x8   :  { %19 = vsyncpa [#allocation4 + $0x1], 0  ;;  %s2707_s21 = smov 0   ;;  %s2709_s22 = smov 0  }
   0x9   :  { %s2711_s23 = smov 0   ;;  %s2713_s24 = smov 0  }
   0xa LB: > { %s2728_s25 = sadd.s32 4294967295, %s2650_s24   ;;  %s2031_s26 = sadd.s32 4294967294, %s2650_s24   ;;  %s2650_s24 = sphi %s2713_s24, %s3662_s24   ;;  %s2646_s23 = sphi %s2711_s23, %s3661_s23   ;;  %s2642_s22 = sphi %s2709_s22, %s3660_s22   ;;  %s2638_s21 = sphi %s2707_s21, %s3659_s21  }
   0xb   : > { %p45_p0 = scmp.ne.s32.totalorder %s2642_s22, %s2638_s21  ;;  %p3576_p1 = scmp.eq.s32.totalorder %s2728_s25, 0 }
   0xc   : > { %p180_p3 = scmp.eq.s32.totalorder %s2031_s26, 1  ;;  %p2032_p5 = scmp.ge.s32.totalorder %s2650_s24, 1 }
   0xd   : > { %p2737_p4 = por %p3576_p1, %p45_p0  ;;  %p187_p7 = scmp.lt.s32.totalorder %s2650_s24, 3 }
   0xe   : > { %p2742_p6 = por %p180_p3, %p45_p0  ;;  %s2652_s30 = smov [#allocation6]  }
   0xf   : > { %s3599_s27 = scalar_select %p2737_p4, 1, 0 }
  0x10   : > { %s3600_s28 = scalar_select %p2742_p6, 1, 0 }
  0x11   : > { %p2747_p8 = pnand %p2032_p5, %p187_p7  ;;  %s199_s7 = sshll.u32 %s2652_s30, 4  ;;  %s2751_s7 = int_to_ptr.vmem [resolvable:$true] %s199_s7 }
  0x12   : > { %s2653_s9 = smov [#allocation8]   ;;  %s3603_s1 = sld [smem:[#allocation34_spill]] }
  0x13   : > { %s3601_s29 = scalar_select %p2747_p8, 1, 0 }
  0x14   : > { %p2204_p9 = pneg %p2747_p8  ;;  %s212_s10 = sshll.u32 %s2653_s9, 4  ;;  %s2762_s10 = int_to_ptr.vmem [resolvable:$true] %s212_s10 }
  0x16   : > { %p2758_p11 = pnand %p2204_p9, %p3576_p1 }
  0x18   : > { %s2443_s13 = scalar_lea.hbm %s3603_s1, 4096  ;;  %p2772_p13 = pneg %p2758_p11 }
  0x19   : > { %p2444_p12 = scmp.ne.s32.totalorder %s3603_s1, %s2443_s13  ;;  %p2450_p5 = scmp.lt.u32.totalorder %s2443_s13, %s3603_s1 }
  0x1b   : > { %p2446_p0 = pnand %p2772_p13, %p2444_p12 }
  0x1d   : > { %p2447_p3 = pneg %p2446_p0 }
  0x1f   : > { %p2452_p7 = pnand %p2450_p5, %p2447_p3 }
  0x21   : > { %2455 = shalt.err (!%p2452_p7)
}
  0x22   : > { %s2456_s19 = scalar_lea.vmem %s2751_s7, 4096  ;;  %p2464_p2 = scmp.lt.s32.totalorder %s2751_s7, %s2751_s7 }
  0x23   : > { %p2457_p9 = scmp.ne.s32.totalorder %s2751_s7, %s2456_s19  ;;  %p2465_p6 = scmp.lt.s32.totalorder %s2456_s19, %s2456_s19 }
  0x25   : > { %p2459_p10 = pnand %p2457_p9, %p2772_p13  ;;  %p2466_p12 = por %p2465_p6, %p2464_p2 }
  0x27   : > { %p2460_p1 = pneg %p2459_p10 }
  0x29   : > { %p2467_p0 = pnand %p2466_p12, %p2460_p1 }
  0x2b   : > { %2470 = shalt.err (!%p2467_p0)
}
  0x2c   : > { %s2654_s20 = smov 256   ;;  %s2655_s26 = smov 16  }
  0x2d   : > { %2207 = dma.hbm_to_vmem [thread:$0]  (!%p2758_p11), %s3603_s1, 4096, %s2751_s7, [#allocation7], %s2654_s20, %s2654_s20, %s2655_s26  }
  0x2e   : > { %s2471_s13 = scalar_lea.hbm %s3571_s2, 4096 }
  0x2f   : > { %p2472_p2 = scmp.ne.s32.totalorder %s3571_s2, %s2471_s13  ;;  %p2478_p10 = scmp.lt.u32.totalorder %s2471_s13, %s3571_s2 }
  0x31   : > { %p2474_p1 = pnand %p2472_p2, %p2772_p13 }
  0x33   : > { %p2475_p6 = pneg %p2474_p1 }
  0x35   : > { %p2480_p3 = pnand %p2478_p10, %p2475_p6 }
  0x37   : > { %2483 = shalt.err (!%p2480_p3)
}
  0x38   : > { %s2484_s7 = scalar_lea.vmem %s2762_s10, 4096  ;;  %p2492_p12 = scmp.lt.s32.totalorder %s2762_s10, %s2762_s10 }
  0x39   : > { %p2485_p5 = scmp.ne.s32.totalorder %s2762_s10, %s2484_s7  ;;  %p2493_p0 = scmp.lt.s32.totalorder %s2484_s7, %s2484_s7 }
  0x3b   : > { %p2487_p7 = pnand %p2485_p5, %p2772_p13  ;;  %p2494_p2 = por %p2493_p0, %p2492_p12 }
  0x3d   : > { %p2488_p9 = pneg %p2487_p7 }
  0x3f   : > { %p2495_p1 = pnand %p2494_p2, %p2488_p9 }
  0x41   : > { %2498 = shalt.err (!%p2495_p1)
}
  0x42   : > { %s2656_s19 = smov 64   ;;  %s2657_s20 = smov 4  }
  0x43   : > { %2210 = dma.hbm_to_vmem [thread:$0]  (!%p2758_p11), %s3571_s2, 4096, %s2762_s10, [#allocation7], %s2656_s19, %s2656_s19, %s2657_s20  }
  0x44   : > { %s2658_s9 = smov [#allocation9]   ;;  %s242_s14 = sshll.u32 %s3574_s5, 4  ;;  %s243_s14 = int_to_ptr.vmem [resolvable:$true] %s242_s14 }
  0x45   : > { %s225_s11 = sshll.u32 %s2658_s9, 4  ;;  %s2499_s18 = scalar_lea.hbm %s3572_s3, 1024  ;;  %s226_s11 = int_to_ptr.vmem [resolvable:$true] %s225_s11 }
  0x46   : > { %p2500_p6 = scmp.ne.s32.totalorder %s3572_s3, %s2499_s18  ;;  %p2506_p5 = scmp.lt.u32.totalorder %s2499_s18, %s3572_s3 }
  0x48   : > { %p2502_p10 = pnand %p2500_p6, %p2772_p13 }
  0x4a   : > { %p2503_p3 = pneg %p2502_p10 }
  0x4c   : > { %p2508_p7 = pnand %p2506_p5, %p2503_p3 }
  0x4e   : > { %2511 = shalt.err (!%p2508_p7)
}
  0x4f   : > { %s2512_s19 = scalar_lea.vmem %s226_s11, 1024  ;;  %p2520_p2 = scmp.lt.s32.totalorder %s226_s11, %s226_s11 }
  0x50   : > { %p2513_p9 = scmp.ne.s32.totalorder %s226_s11, %s2512_s19  ;;  %p2521_p1 = scmp.lt.s32.totalorder %s2512_s19, %s2512_s19 }
  0x52   : > { %p2515_p12 = pnand %p2513_p9, %p2772_p13  ;;  %p2522_p4 = por %p2521_p1, %p2520_p2 }
  0x54   : > { %p2516_p0 = pneg %p2515_p12 }
  0x56   : > { %p2523_p8 = pnand %p2522_p4, %p2516_p0 }
  0x58   : > { %2526 = shalt.err (!%p2523_p8)
}
  0x59   : > { %s2659_s1 = smov 512   ;;  %s2660_s20 = smov 32  }
  0x5a   : > { %2213 = dma.hbm_to_vmem [thread:$0]  (!%p2758_p11), %s3572_s3, 1024, %s226_s11, [#allocation10], %s2659_s1, %s2659_s1, %s2660_s20  }
  0x5b   : > { %s2527_s12 = scalar_lea.vmem %s243_s14, 16  ;;  %p2535_p5 = scmp.lt.s32.totalorder %s243_s14, %s243_s14 }
  0x5c   : > { %p2528_p6 = scmp.ne.s32.totalorder %s243_s14, %s2527_s12  ;;  %p2536_p7 = scmp.lt.s32.totalorder %s2527_s12, %s2527_s12 }
  0x5e   : > { %p2530_p10 = pnand %p2528_p6, %p2772_p13  ;;  %p2537_p9 = por %p2536_p7, %p2535_p5 }
  0x60   : > { %p2531_p3 = pneg %p2530_p10 }
  0x62   : > { %p2538_p4 = pnand %p2537_p9, %p2531_p3 }
  0x64   : > { %2541 = shalt.err (!%p2538_p4)
}
  0x65   : > { %s2661_s13 = smov [#allocation11]   ;;  %s2842_s16 = sadd.s32 1, %s2650_s24  }
  0x66   : > { %2216 = dma.vmem_to_smem (!%p2758_p11), %s243_s14, 16, %s2661_s13, [#allocation5]  }
  0x67   : > { %s29_s11 = ssub.s32 %s2650_s24, %s2842_s16  ;;  %s32_s15 = sadd.s32 1, %s2646_s23 }
  0x68   : > { %p30_p8 = scmp.eq.s32.totalorder %s29_s11, 0  ;;  %p39_p13 = scmp.ne.s32.totalorder %s2646_s23, %s2642_s22 }
  0x69   : > { %p40_p12 = scmp.eq.s32.totalorder %s2650_s24, 0  ;;  %p3605_p2 = scmp.eq.s32.totalorder %s2728_s25, 1 }
  0x6a   : > { %s2851_s8 = scalar_select %p30_p8, %s2646_s23, %s32_s15  }
  0x6b   : > { %p41_p0 = por %p40_p12, %p39_p13  ;;  %p2855_p1 = por %p3605_p2, %p39_p13 }
  0x6c   : > { %p2229_p6 = scmp.lt.s32.totalorder %s2650_s24, 2  ;;  %s253_s18 = sand.u32 1, %s2646_s23  }
  0x6d   : > { %s2038_s7 = sshll.u32 %s253_s18, 4  ;;  %s2138_s14 = sshll.u32 %s2650_s24, 8 }
  0x6e   : > { %s2865_s19 = scalar_lea.hbm %s3569_s0, %s2138_s14  ;;  %s257_s1 = scalar_lea.vmem [#allocation2], %s2038_s7 }
  0x6f   : > { %s264_s20 = sshll.u32 %s257_s1, 4  ;;  %p2869_p11 = pnand %p2229_p6, %p41_p0  ;;  %s2867_s20 = int_to_ptr.vmem [resolvable:$true] %s264_s20 }
  0x70   : > { %s2873_s9 = scalar_lea.sflag [#allocation3], %s253_s18  ;;  %s2542_s12 = scalar_lea.hbm %s2865_s19, 256 }
  0x71   : > { %p2543_p10 = scmp.ne.s32.totalorder %s2865_s19, %s2542_s12  ;;  %p2544_p3 = pneg %p2869_p11 }
  0x72   : > { %s2547_s15 = scalar_lea.hbm %s3569_s0, 512  ;;  %p2548_p9 = scmp.lt.u32.totalorder %s2865_s19, %s3569_s0 }
  0x73   : > { %p2545_p5 = pnand %p2544_p3, %p2543_p10  ;;  %p2549_p4 = scmp.lt.u32.totalorder %s2547_s15, %s2542_s12 }
  0x74   : > { %p2551_p13 = scmp.lt.u32.totalorder %s2542_s12, %s2865_s19 }
  0x75   : > { %p2546_p7 = pneg %p2545_p5  ;;  %p2550_p8 = por %p2549_p4, %p2548_p9 }
  0x77   : > { %p2552_p12 = por %p2551_p13, %p2550_p8 }
  0x79   : > { %p2553_p0 = pnand %p2552_p12, %p2546_p7 }
  0x7b   : > { %2556 = shalt.err (!%p2553_p0)
}
  0x7c   : > { %s2557_s18 = scalar_lea.vmem %s2867_s20, 256  ;;  %s2662_s26 = smov [#allocation2]  }
  0x7d   : > { %p2558_p2 = scmp.ne.s32.totalorder %s2867_s20, %s2557_s18  ;;  %s2562_s10 = sshll.u32 %s2662_s26, 4  ;;  %s2563_s10 = int_to_ptr.vmem [resolvable:$false] %s2562_s10 }
  0x7e   : > { %s2564_s1 = scalar_lea.vmem %s2563_s10, 512  ;;  %p2565_p5 = scmp.lt.s32.totalorder %s2867_s20, %s2563_s10 }
  0x7f   : > { %p2560_p6 = pnand %p2558_p2, %p2544_p3  ;;  %p2566_p9 = scmp.lt.s32.totalorder %s2564_s1, %s2557_s18 }
  0x81   : > { %p2561_p10 = pneg %p2560_p6  ;;  %p2567_p4 = por %p2566_p9, %p2565_p5 }
  0x83   : > { %p2568_p8 = pnand %p2567_p4, %p2561_p10 }
  0x85   : > { %2571 = shalt.err (!%p2568_p8)
}
  0x86   : > { %s2663_s12 = smov 128   ;;  %s2664_s13 = smov 8  }
  0x87   : > { %2220 = dma.hbm_to_vmem [thread:$0]  (!%p2869_p11), %s2865_s19, 256, %s2867_s20, %s2873_s9, %s2663_s12, %s2663_s12, %s2664_s13  }
  0x88   : > { %p3608_p3 = scmp.ne.s32.totalorder %s3601_s29, 0 }
  0x8a   : > { %276 = sbr.rel (%p3608_p3) target bundleno = 1109 (0x455), region = 44 }
  0x91   : > { %s2904_s11 = sand.u32 1, %s2642_s22   ;;  %p3609_p7 = scmp.ne.s32.totalorder %s3599_s27, 0 }
  0x92   : > { %s2042_s15 = sshll.u32 %s2904_s11, 4  ;;  %s279_s7 = scalar_lea.sflag [#allocation3], %s2904_s11 }
  0x93   : > { %s2910_s14 = scalar_lea.vmem [#allocation2], %s2042_s15 }
  0x94   : > { %2617 = dma.done.wait (%p3609_p7), %s279_s7, 256  }
  0x95   : > { %2619 = vsyncadd (%p3609_p7), %s279_s7, 4294967040  ;;  %p3610_p11 = scmp.eq.s32.totalorder %s2728_s25, 0 }
  0x97   : > { %2621 = dma.done.wait (%p3610_p11), [#allocation7], 8192   ;;  %p3611_p13 = pmov %p3610_p11 }
  0x98   : > { %p3612_p12 = pmov %p3610_p11 }
  0x99   : > { %2623 = vsyncadd (%p3611_p13), [#allocation7], 4294959104 }
  0x9a   : > { %2625 = dma.done.wait (%p3612_p12), [#allocation10], 1024   ;;  %p3613_p0 = pmov %p3610_p11 }
  0x9c   : > { %2627 = vsyncadd (%p3613_p0), [#allocation10], 4294966272  ;;  %p3614_p2 = pmov %p3613_p0 }
  0x9d   : > { %p3615_p6 = pmov %p3613_p0 }
  0x9e   : > { %2629 = dma.done.wait (%p3614_p2), [#allocation5], 16  }
  0x9f   : > { %2631 = vsyncadd (%p3615_p6), [#allocation5], 4294967280 }
  0xa0   : > { %303 = sfence }
  0xa1   : > { %v2285_v0 = vld [vmem:[#allocation6 + $0x4] ss:$16 sps:$4 sm:$0xff]   ;;  %v2287_v1 = vld [vmem:[#allocation6 + $0xc] ss:$16 sps:$4 sm:$0xff]   ;;  %v2665_v2 = vmov 0   ;;  %v3579_v36 = vlaneseq  ;;  %s2666_s27 = smov 32  }
  0xa2   : > { %579 = vmatprep.mubr.bf16.mxu0 %v2665_v2  ;;  %622 = vmatprep.mubr.bf16.mxu1 %v2665_v2  ;;  %v2289_v3 = vld [vmem:[#allocation6] ss:$16 sps:$4 sm:$0xff]   ;;  %v2290_v4 = vld [vmem:[#allocation6 + $0x8] ss:$16 sps:$4 sm:$0xff]   ;;  %v2291_v5 = vld [vmem:[#allocation6 + $0x24] ss:$16 sps:$4 sm:$0xff]  }
  0xa3   : > { %547 = vmatprep.subr.bf16.mxu0 %v2285_v0  ;;  %590 = vmatprep.subr.bf16.mxu1 %v2287_v1  ;;  %v2293_v6 = vld [vmem:[#allocation6 + $0x2c] ss:$16 sps:$4 sm:$0xff]   ;;  %v2295_v7 = vld [vmem:[#allocation6 + $0x20] ss:$16 sps:$4 sm:$0xff]   ;;  %v2296_v8 = vld [vmem:[#allocation6 + $0x28] ss:$16 sps:$4 sm:$0xff]  }
  0xa4   : > { %548 = vmatpush1.bf16.msra.mxu0 %v2289_v3  ;;  %591 = vmatpush1.bf16.msra.mxu1 %v2290_v4  ;;  %v2297_v9 = vld [vmem:[#allocation6 + $0x44] ss:$16 sps:$4 sm:$0xff]   ;;  %v2299_v10 = vld [vmem:[#allocation6 + $0x4c] ss:$16 sps:$4 sm:$0xff]   ;;  %v2301_v11 = vld [vmem:[#allocation6 + $0x40] ss:$16 sps:$4 sm:$0xff]  }
  0xa5   : > { %549 = vmatprep.subr.bf16.mxu0 %v2291_v5  ;;  %592 = vmatprep.subr.bf16.mxu1 %v2293_v6  ;;  %v2302_v12 = vld [vmem:[#allocation6 + $0x48] ss:$16 sps:$4 sm:$0xff]   ;;  %v2303_v13 = vld [vmem:[#allocation6 + $0x64] ss:$16 sps:$4 sm:$0xff]   ;;  %v2305_v14 = vld [vmem:[#allocation6 + $0x6c] ss:$16 sps:$4 sm:$0xff]  }
  0xa6   : > { %v2307_v15 = vld [vmem:[#allocation6 + $0x60] ss:$16 sps:$4 sm:$0xff]   ;;  %v2308_v16 = vld [vmem:[#allocation6 + $0x68] ss:$16 sps:$4 sm:$0xff]   ;;  %v2309_v17 = vld [vmem:[#allocation6 + $0x84] ss:$16 sps:$4 sm:$0xff]  }
  0xa7   : > { %v2311_v18 = vld [vmem:[#allocation6 + $0x8c] ss:$16 sps:$4 sm:$0xff]   ;;  %v2313_v19 = vld [vmem:[#allocation6 + $0x80] ss:$16 sps:$4 sm:$0xff]   ;;  %v2314_v20 = vld [vmem:[#allocation6 + $0x88] ss:$16 sps:$4 sm:$0xff]  }
  0xa8   : > { %550 = vmatpush1.bf16.msra.mxu0 %v2295_v7  ;;  %593 = vmatpush1.bf16.msra.mxu1 %v2296_v8  ;;  %v2315_v21 = vld [vmem:[#allocation6 + $0xa4] ss:$16 sps:$4 sm:$0xff]   ;;  %v2317_v22 = vld [vmem:[#allocation6 + $0xac] ss:$16 sps:$4 sm:$0xff]   ;;  %v2319_v23 = vld [vmem:[#allocation6 + $0xa0] ss:$16 sps:$4 sm:$0xff]  }
  0xa9   : > { %551 = vmatprep.subr.bf16.mxu0 %v2297_v9  ;;  %594 = vmatprep.subr.bf16.mxu1 %v2299_v10  ;;  %v2320_v24 = vld [vmem:[#allocation6 + $0xa8] ss:$16 sps:$4 sm:$0xff]   ;;  %v2321_v25 = vld [vmem:[#allocation6 + $0xc4] ss:$16 sps:$4 sm:$0xff]   ;;  %v2323_v26 = vld [vmem:[#allocation6 + $0xcc] ss:$16 sps:$4 sm:$0xff]  }
  0xaa   : > { %v2325_v27 = vld [vmem:[#allocation6 + $0xc0] ss:$16 sps:$4 sm:$0xff]   ;;  %v2326_v28 = vld [vmem:[#allocation6 + $0xc8] ss:$16 sps:$4 sm:$0xff]   ;;  %v2327_v29 = vld [vmem:[#allocation6 + $0xe4] ss:$16 sps:$4 sm:$0xff]  }
  0xab   : > { %v2329_v30 = vld [vmem:[#allocation6 + $0xec] ss:$16 sps:$4 sm:$0xff]   ;;  %v2331_v31 = vld [vmem:[#allocation6 + $0xe0] ss:$16 sps:$4 sm:$0xff]   ;;  %v2332_v32 = vld [vmem:[#allocation6 + $0xe8] ss:$16 sps:$4 sm:$0xff]  }
  0xac   : > { %552 = vmatpush1.bf16.msra.mxu0 %v2301_v11  ;;  %595 = vmatpush1.bf16.msra.mxu1 %v2302_v12  ;;  %v329_v33 = vld [vmem:[%s2910_s14] sm:$0xff]  ;;  %v330_v34 = vld [vmem:[%s2910_s14 + $0x8] sm:$0xff]  ;;  %v2931_v37 = vshrl.u32 %v3579_v36, 7  ;;  %s2667_s29 = smov 96   ;;  %vm1335_vm8 = vcmask 1040384   ;;  %s2097_s19 = sld [smem:[#allocation11 + $0x1]] }
  0xad   : > { %553 = vmatprep.subr.bf16.mxu0 %v2303_v13  ;;  %596 = vmatprep.subr.bf16.mxu1 %v2305_v14  ;;  %v331_v35 = vpack.c.bf16 %v330_v34, %v329_v33  ;;  %v365_v40 = vld [vmem:[#allocation9 + $0x21] ss:$8 sm:$0xf]  ;;  %v798_v8 = vld [vmem:[#allocation9 + $0x3] ss:$8 sm:$0xf] }
  0xae   : > { %v2934_v38 = vsub.s32 0, %v2931_v37  ;;  %v2937_v39 = vsub.s32 2, %v2931_v37  ;;  %v2940_v41 = vsub.s32 1, %v2931_v37  ;;  %v2943_v42 = vsub.s32 3, %v2931_v37  ;;  %s1345_s20 = sld [smem:[#allocation11]]  ;;  %s327_s18 = scalar_lea.vmem [#allocation12], %s2042_s15 }
  0xaf   : > { %v1016_v11 = vld [vmem:[#allocation9 + $0x5] ss:$8 sm:$0xf]  ;;  %v767_v14 = vld [vmem:[#allocation9] ss:$8 sm:$0xf] }
  0xb0   : > { %554 = vmatpush1.bf16.msra.mxu0 %v2307_v15  ;;  %597 = vmatpush1.bf16.msra.mxu1 %v2308_v16  ;;  %3616 = vst [vmem:[#allocation18_spill] sm:$0xff] %v2934_v38  ;;  %3617 = vst [vmem:[#allocation19_spill] sm:$0xff] %v2943_v42  ;;  %v370_v43 = vrot.slane %v365_v40, %v2934_v38  ;;  %v378_v44 = vrot.slane %v365_v40, %v2937_v39  ;;  %vm717_vm0 = vcmp.lt.s32.totalorder %v2931_v37, 1  ;;  %s1917_s26 = sshll.u32 %s327_s18, 4  ;;  %s2139_s10 = sshll.u32 %s2728_s25, 8  ;;  %s3519_s26 = int_to_ptr.vmem [resolvable:$true] %s1917_s26 }
  0xb1   : > { %555 = vmatprep.subr.bf16.mxu0 %v2309_v17  ;;  %598 = vmatprep.subr.bf16.mxu1 %v2311_v18  ;;  %v374_v45 = vrot.slane %v365_v40, %v2940_v41  ;;  %v382_v46 = vrot.slane %v365_v40, %v2943_v42  ;;  %v837_v17 = vld [vmem:[#allocation9 + $0x6] ss:$8 sm:$0xf]  ;;  %v2992_v34 = vrot.slane %v767_v14, %v2934_v38  ;;  %vm746_vm1 = vcmp.lt.s32.totalorder %v2931_v37, 7  ;;  %s3524_s13 = scalar_lea.hbm %s3575_s6, %s2139_s10  ;;  %s1904_s15 = scalar_lea.sflag [#allocation4], %s2904_s11 }
  0xb2   : > { %vm692_vm3 = vcmp.ne.s32.totalorder %v2931_v37, 0  ;;  %s2572_s7 = scalar_lea.vmem %s3519_s26, 256  ;;  %s2669_s25 = smov [#allocation12]  }
  0xb3   : > { %p2573_p10 = scmp.ne.s32.totalorder %s3519_s26, %s2572_s7 }
  0xb4   : > { %556 = vmatpush1.bf16.msra.mxu0 %v2313_v19  ;;  %599 = vmatpush1.bf16.msra.mxu1 %v2314_v20  ;;  %v2974_v20 = vrot.slane %v798_v8, %v2937_v39 }
  0xb5   : > { %557 = vmatprep.subr.bf16.mxu0 %v2315_v21  ;;  %600 = vmatprep.subr.bf16.mxu1 %v2317_v22  ;;  %v2977_v21 = vrot.slane %v798_v8, %v2934_v38  ;;  %v985_v22 = vld [vmem:[#allocation9 + $0x2] ss:$8 sm:$0xf]  ;;  %p2574_p5 = pnand %p2573_p10, %p2855_p1 }
  0xb7   : > { %p2575_p9 = pneg %p2574_p5 }
  0xb8   : > { %558 = vmatpush1.bf16.msra.mxu0 %v2319_v23  ;;  %601 = vmatpush1.bf16.msra.mxu1 %v2320_v24 }
  0xb9   : > { %559 = vmatprep.subr.bf16.mxu0 %v2321_v25  ;;  %602 = vmatprep.subr.bf16.mxu1 %v2323_v26  ;;  %v2980_v25 = vadd.s32 8, %v2931_v37  ;;  %v2983_v26 = vrot.slane %v1016_v11, %v2934_v38 }
  0xbb   : > { %vm695_vm2 = vcmp.ne.s32.totalorder %v2980_v25, 15 }
  0xbc   : > { %560 = vmatpush1.bf16.msra.mxu0 %v2325_v27  ;;  %603 = vmatpush1.bf16.msra.mxu1 %v2326_v28  ;;  %v1055_v27 = vld [vmem:[#allocation9 + $0x20] ss:$8 sm:$0xf] }
  0xbd   : > { %561 = vmatprep.subr.bf16.mxu0 %v2327_v29  ;;  %604 = vmatprep.subr.bf16.mxu1 %v2329_v30  ;;  %v2986_v30 = vrot.slane %v767_v14, %v2937_v39 }
  0xc0   : > { %562 = vmatpush1.bf16.msra.mxu0 %v2331_v31  ;;  %605 = vmatpush1.bf16.msra.mxu1 %v2332_v32  ;;  %v2989_v31 = vrot.slane %v837_v17, %v2937_v39 }
  0xc3   : > { %580 = vmatmul.mubr.bf16.vlgmr.msra.gmra.mrb[0].mxu0 %v331_v35  ;;  %623 = vmatmul.mubr.bf16.vlgmr.msra.gmra.mrb[0].mxu1 %v331_v35  ;;  %v2995_v35 = vrot.slane %v837_v17, %v2934_v38 }
 0x196   : > { %v581_v47 = vpop.f32.mrb[0].mxu0  ;;  %v624_v48 = vpop.f32.mrb[0].mxu1 }
 0x197   : > { %v2949_v49 = vadd.f32 %v581_v47, %v370_v43  ;;  %v2951_v50 = vadd.f32 %v624_v48, %v378_v44  ;;  %v583_v51 = vpop.f32.mrb[1].mxu0  ;;  %v626_v52 = vpop.f32.mrb[1].mxu1  ;;  %v3010_v47 = vrot.slane %v798_v8, %v2940_v41  ;;  %v3012_v48 = vld [vmem:[#allocation9 + $0x4] ss:$8 sm:$0xf] }
 0x198   : > { %v2953_v53 = vadd.f32 %v583_v51, %v374_v45  ;;  %v2955_v54 = vadd.f32 %v626_v52, %v382_v46  ;;  %v585_v55 = vpop.f32.mrb[2].mxu0  ;;  %v628_v56 = vpop.f32.mrb[2].mxu1  ;;  %3618 = vst [vmem:[#allocation20_spill] sm:$0xff] %v3012_v48  ;;  %v3015_v51 = vrot.slane %v837_v17, %v2943_v42  ;;  %v3018_v52 = vrot.slane %v1016_v11, %v2940_v41 }
 0x199   : > { %v2080_v57 = vmul.f32 -1.442695, %v2949_v49  ;;  %v2082_v58 = vmul.f32 -1.442695, %v2951_v50  ;;  %v2959_v59 = vadd.f32 %v585_v55, %v370_v43  ;;  %v2961_v60 = vadd.f32 %v628_v56, %v378_v44  ;;  %v587_v61 = vpop.f32.mrb[3].mxu0  ;;  %v630_v62 = vpop.f32.mrb[3].mxu1 }
 0x19a   : > { %v2081_v63 = vmul.f32 -1.442695, %v2953_v53  ;;  %v2083_v0 = vmul.f32 -1.442695, %v2955_v54  ;;  %v2965_v1 = vadd.f32 %v587_v61, %v374_v45  ;;  %v2967_v2 = vadd.f32 %v630_v62, %v382_v46 }
 0x19b   : > { %2365 = vpow2.f32 %v2080_v57  ;;  %v2084_v3 = vmul.f32 -1.442695, %v2959_v59  ;;  %v2086_v4 = vmul.f32 -1.442695, %v2961_v60  ;;  %v2998_v43 = vrot.slane %v985_v22, %v2934_v38 }
 0x19c   : > { %2367 = vpow2.f32 %v2082_v58  ;;  %v2085_v5 = vmul.f32 -1.442695, %v2965_v1  ;;  %v2087_v6 = vmul.f32 -1.442695, %v2967_v2  ;;  %v3001_v44 = vrot.slane %v1055_v27, %v2934_v38 }
 0x19d   : > { %2369 = vpow2.f32 %v2081_v63  ;;  %v3004_v45 = vrot.slane %v767_v14, %v2943_v42  ;;  %v3007_v46 = vrot.slane %v798_v8, %v2943_v42  ;;  %v3021_v55 = vrot.slane %v1016_v11, %v2937_v39  ;;  %v876_v62 = vld [vmem:[#allocation9 + $0x1] ss:$8 sm:$0xf]  ;;  %v3037_v63 = vld [vmem:[#allocation9 + $0x7] ss:$8 sm:$0xf] }
 0x19e   : > { %2371 = vpow2.f32 %v2083_v0  ;;  %v3026_v56 = vrot.slane %v767_v14, %v2940_v41  ;;  %v3029_v57 = vrot.slane %v837_v17, %v2940_v41  ;;  %v3032_v58 = vrot.slane %v985_v22, %v2940_v41 }
 0x19f   : > { %2373 = vpow2.f32 %v2084_v3  ;;  %v3035_v61 = vrot.slane %v985_v22, %v2937_v39  ;;  %v3041_v0 = vrot.slane %v1055_v27, %v2940_v41  ;;  %v3044_v3 = vrot.slane %v1055_v27, %v2937_v39 }
 0x1a0   : > { %2375 = vpow2.f32 %v2086_v4  ;;  %v3047_v4 = vrot.slane %v1016_v11, %v2943_v42  ;;  %v3057_v8 = vrot.slane %v1055_v27, %v2943_v42  ;;  %v3075_v14 = vrot.slane %v876_v62, %v2943_v42 }
 0x1a1   : > { %2377 = vpow2.f32 %v2085_v5  ;;  %v3051_v5 = vrot.slane %v3012_v48, %v2934_v38 }
 0x1a2   : > { %2379 = vpow2.f32 %v2087_v6 }
 0x1a3   : > { %3619 = vst [vmem:[#allocation21_spill] sm:$0xff] %v3051_v5 }
 0x1a5   : > { %v2366_v7 = vpop.eup %2365 }
 0x1a6   : > { %v2368_v9 = vpop.eup %2367  ;;  %v657_v10 = vadd.f32 1.0, %v2366_v7  ;;  %v3054_v7 = vrot.slane %v985_v22, %v2943_v42 }
 0x1a7   : > { %v2370_v12 = vpop.eup %2369  ;;  %v659_v13 = vadd.f32 1.0, %v2368_v9  ;;  %v3061_v9 = vrot.slane %v3012_v48, %v2943_v42 }
 0x1a8   : > { %v2372_v15 = vpop.eup %2371  ;;  %2381 = vrcp.f32 %v657_v10  ;;  %v658_v16 = vadd.f32 1.0, %v2370_v12  ;;  %v3065_v10 = vrot.slane %v3012_v48, %v2937_v39 }
 0x1a9   : > { %v2374_v18 = vpop.eup %2373  ;;  %2383 = vrcp.f32 %v659_v13  ;;  %v660_v19 = vadd.f32 1.0, %v2372_v15  ;;  %3620 = vst [vmem:[#allocation22_spill] sm:$0xff] %v3061_v9  ;;  %v3072_v13 = vrot.slane %v876_v62, %v2934_v38  ;;  %v3079_v15 = vrot.slane %v3037_v63, %v2934_v38 }
 0x1aa   : > { %v2376_v23 = vpop.eup %2375  ;;  %2385 = vrcp.f32 %v658_v16  ;;  %v661_v24 = vadd.f32 1.0, %v2374_v18  ;;  %3621 = vst [vmem:[#allocation23_spill] sm:$0xff] %v3065_v10  ;;  %v3089_v18 = vrot.slane %v876_v62, %v2940_v41 }
 0x1ab   : > { %v2378_v28 = vpop.eup %2377  ;;  %2387 = vrcp.f32 %v660_v19  ;;  %v663_v29 = vadd.f32 1.0, %v2376_v23  ;;  %3623 = vst [vmem:[#allocation25_spill] sm:$0xff] %v3072_v13  ;;  %3624 = vst [vmem:[#allocation26_spill] sm:$0xff] %v3079_v15  ;;  %v3092_v19 = vrot.slane %v876_v62, %v2937_v39 }
 0x1ac   : > { %v2380_v32 = vpop.eup %2379  ;;  %2389 = vrcp.f32 %v661_v24  ;;  %v662_v33 = vadd.f32 1.0, %v2378_v28  ;;  %3627 = vst [vmem:[#allocation29_spill] sm:$0xff] %v3089_v18 }
 0x1ad   : > { %2391 = vrcp.f32 %v663_v29  ;;  %v664_v40 = vadd.f32 1.0, %v2380_v32  ;;  %3628 = vst [vmem:[#allocation30_spill] sm:$0xff] %v3092_v19 }
 0x1ae   : > { %2393 = vrcp.f32 %v662_v33 }
 0x1af   : > { %2395 = vrcp.f32 %v664_v40 }
 0x1b2   : > { %v2382_v6 = vpop.eup %2381 }
 0x1b3   : > { %v2384_v11 = vpop.eup %2383  ;;  %v3068_v12 = vmul.f32 %v2382_v6, %v2949_v49  ;;  %v3086_v49 = vrot.slane %v3037_v63, %v2943_v42 }
 0x1b4   : > { %v2386_v16 = vpop.eup %2385  ;;  %v3082_v17 = vmul.f32 %v2384_v11, %v2951_v50 }
 0x1b5   : > { %3622 = vst [vmem:[#allocation24_spill] sm:$0xff] %v3068_v12  ;;  %3626 = vst [vmem:[#allocation28_spill] sm:$0xff] %v3086_v49  ;;  %v2388_v22 = vpop.eup %2387  ;;  %v3095_v23 = vmul.f32 %v2386_v16, %v2953_v53  ;;  %v709_v24 = vrot.slane %v3068_v12, 7  ;;  %v738_v27 = vrot.slane %v3068_v12, 1  ;;  %v820_v50 = vmul.f32 %v2977_v21, %v3068_v12 }
 0x1b6   : > { %3625 = vst [vmem:[#allocation27_spill] sm:$0xff] %v3082_v17  ;;  %v2390_v28 = vpop.eup %2389  ;;  %v3102_v29 = vmul.f32 %v2388_v22, %v2955_v54  ;;  %v711_v32 = vrot.slane %v3082_v17, 7  ;;  %v740_v33 = vrot.slane %v3082_v17, 1  ;;  %v3108_v40 = vmul.f32 %v2974_v20, %v3082_v17 }
 0x1b7   : > { %v2392_v53 = vpop.eup %2391  ;;  %v3111_v62 = vmul.f32 %v2390_v28, %v2959_v59  ;;  %v3117_v54 = vmul.f32 %v2983_v26, %v3068_v12  ;;  %v3126_v59 = vmul.f32 %v3021_v55, %v3082_v17 }
 0x1b8   : > { %v2394_v16 = vpop.eup %2393  ;;  %v3120_v22 = vmul.f32 %v2392_v53, %v2961_v60 }
 0x1b9   : > { %3629 = vst [vmem:[#allocation31_spill] sm:$0xff] %v3111_v62  ;;  %v2396_v28 = vpop.eup %2395  ;;  %v3129_v6 = vmul.f32 %v2394_v16, %v2965_v1  ;;  %v713_v11 = vrot.slane %v3111_v62, 7  ;;  %v742_v38 = vrot.slane %v3111_v62, 1  ;;  %v824_v60 = vmul.f32 %v2977_v21, %v3111_v62 }
 0x1ba   : > { %v3136_v53 = vmul.f32 %v2396_v28, %v2967_v2  ;;  %v715_v42 = vrot.slane %v3120_v22, 7  ;;  %v744_v36 = vrot.slane %v3120_v22, 1  ;;  %v826_v17 = vmul.f32 %v2974_v20, %v3120_v22 }
 0x1bb   : > { %v3144_v1 = vsel %vm717_vm0, %v709_v24, %v713_v11  ;;  %v751_v16 = vsel %vm746_vm1, %v742_v38, %v738_v27  ;;  %v1042_v21 = vmul.f32 %v2983_v26, %v3111_v62  ;;  %v722_v2 = vsel %vm717_vm0, %v713_v11, %v709_v24 }
 0x1bc   : > { %3630 = vst [vmem:[#allocation32_spill] sm:$0xff] %v3144_v1  ;;  %v3154_v28 = vsel %vm717_vm0, %v711_v32, %v715_v42  ;;  %v753_v20 = vsel %vm746_vm1, %v744_v36, %v740_v33  ;;  %v3160_v12 = vsel %vm695_vm2, %v751_v16, 0.0  ;;  %v793_v10 = vmul.f32 %v2992_v34, %v3144_v1 }
 0x1bd   : > { %3631 = vst [vmem:[#allocation33_spill] sm:$0xff] %v3160_v12  ;;  %v3166_v26 = vsel %vm695_vm2, %v753_v20, 0.0  ;;  %v795_v24 = vmul.f32 %v2986_v30, %v3154_v28  ;;  %v863_v11 = vmul.f32 %v2995_v35, %v3160_v12  ;;  %v1011_v19 = vmul.f32 %v2998_v43, %v3144_v1 }
 0x1be   : > { %v865_v16 = vmul.f32 %v2989_v31, %v3166_v26  ;;  %v832_v18 = vadd.f32 %v824_v60, %v793_v10  ;;  %v1081_v13 = vmul.f32 %v3001_v44, %v3160_v12  ;;  %v3180_v20 = vsel %vm692_vm3, %v722_v2, 0.0 }
 0x1bf   : > { %v834_v15 = vadd.f32 %v826_v17, %v795_v24  ;;  %v1050_v48 = vadd.f32 %v1042_v21, %v1011_v19  ;;  %v3184_v49 = vsel %vm746_vm1, %v738_v27, %v742_v38  ;;  %v789_v1 = vmul.f32 %v2992_v34, %v3180_v20 }
 0x1c0   : > { %v871_v5 = vadd.f32 %v863_v11, %v832_v18  ;;  %v859_v10 = vmul.f32 %v2995_v35, %v3184_v49  ;;  %v716_v60 = vrot.slane %v3136_v53, 7  ;;  %v745_v12 = vrot.slane %v3136_v53, 1 }
 0x1c1   : > { %v873_v62 = vadd.f32 %v865_v16, %v834_v15  ;;  %v1089_v2 = vadd.f32 %v1081_v13, %v1050_v48  ;;  %v828_v9 = vadd.f32 %v820_v50, %v789_v1  ;;  %v827_v17 = vmul.f32 %v3007_v46, %v3136_v53 }
 0x1c2   : > { %1095 = vrot.lane.b32.xlu0 %v871_v5, %s2666_s27  ;;  %v3632_v38 = vrot.slane %v3102_v29, 7  ;;  %v3633_v35 = vrot.slane %v3102_v29, 1  ;;  %v724_v48 = vsel %vm717_vm0, %v715_v42, %v711_v32  ;;  %v3209_v13 = vsel %vm746_vm1, %v740_v33, %v744_v36 }
 0x1c3   : > { %1103 = vrot.lane.b32.xlu1 %v873_v62, %s2666_s27  ;;  %v867_v5 = vadd.f32 %v859_v10, %v828_v9  ;;  %v3220_v27 = vsel %vm692_vm3, %v724_v48, 0.0  ;;  %v861_v9 = vmul.f32 %v2989_v31, %v3209_v13  ;;  %v714_v50 = vrot.slane %v3129_v6, 7 }
 0x1c4   : > { %v3199_v34 = vsel %vm717_vm0, %v3632_v38, %v716_v60  ;;  %v754_v18 = vsel %vm746_vm1, %v745_v12, %v3633_v35  ;;  %v791_v36 = vmul.f32 %v2986_v30, %v3220_v27  ;;  %v743_v33 = vrot.slane %v3129_v6, 1 }
 0x1c5   : > { %v3214_v15 = vsel %vm695_vm2, %v754_v18, 0.0  ;;  %v796_v19 = vmul.f32 %v3004_v45, %v3199_v34  ;;  %v825_v62 = vmul.f32 %v3010_v47, %v3129_v6  ;;  %v1007_v1 = vmul.f32 %v2998_v43, %v3180_v20 }
 0x1c6   : > { %v866_v42 = vmul.f32 %v3015_v51, %v3214_v15  ;;  %1093 = vrot.lane.b32.xlu0 %v867_v5, %s2666_s27  ;;  %v830_v21 = vadd.f32 %v3108_v40, %v791_v36  ;;  %v3634_v30 = vrot.slane %v3095_v23, 7  ;;  %v1077_v24 = vmul.f32 %v3001_v44, %v3184_v49 }
 0x1c7   : > { %v835_v32 = vadd.f32 %v827_v17, %v796_v19  ;;  %v1043_v11 = vmul.f32 %v3018_v52, %v3129_v6  ;;  %1144 = vrot.lane.b32.xlu1 %v1089_v2, %s2667_s29  ;;  %v3635_v16 = vrot.slane %v3095_v23, 1  ;;  %v1046_v17 = vadd.f32 %v3117_v54, %v1007_v1 }
 0x1c8   : > { %v3240_v31 = vsel %vm717_vm0, %v3634_v30, %v714_v50  ;;  %v869_v38 = vadd.f32 %v861_v9, %v830_v21  ;;  %v1009_v2 = vmul.f32 %v3035_v61, %v3220_v27  ;;  %v3636_v36 = vrot.slane %v3102_v29, 7 }
 0x1c9   : > { %v874_v43 = vadd.f32 %v866_v42, %v835_v32  ;;  %v752_v40 = vsel %vm746_vm1, %v743_v33, %v3635_v16  ;;  %v794_v10 = vmul.f32 %v3026_v56, %v3240_v31  ;;  %v1012_v35 = vmul.f32 %v3032_v58, %v3240_v31 }
 0x1ca   : > { %v3256_v44 = vsel %vm695_vm2, %v752_v40, 0.0  ;;  %v1085_v5 = vadd.f32 %v1077_v24, %v1046_v17  ;;  %1101 = vrot.lane.b32.xlu0 %v869_v38, %s2666_s27  ;;  %v1048_v25 = vadd.f32 %v3126_v59, %v1009_v2  ;;  %v1079_v42 = vmul.f32 %v3044_v3, %v3209_v13 }
 0x1cb   : > { %v833_v18 = vadd.f32 %v825_v62, %v794_v10  ;;  %v864_v48 = vmul.f32 %v3029_v57, %v3256_v44  ;;  %v1082_v19 = vmul.f32 %v3041_v0, %v3256_v44  ;;  %v1051_v54 = vadd.f32 %v1043_v11, %v1012_v35  ;;  %1107 = vrot.lane.b32.xlu1 %v874_v43, %s2666_s27 }
 0x1cc   : > { %v725_v9 = vsel %vm717_vm0, %v716_v60, %v3636_v36  ;;  %v3637_v1 = vrot.slane %v3102_v29, 1  ;;  %v823_v21 = vmul.f32 %v3007_v46, %v3102_v29  ;;  %v1087_v24 = vadd.f32 %v1079_v42, %v1048_v25 }
 0x1cd   : > { %v872_v32 = vadd.f32 %v864_v48, %v833_v18  ;;  %v3277_v62 = vsel %vm692_vm3, %v725_v9, 0.0  ;;  %v1090_v30 = vadd.f32 %v1082_v19, %v1051_v54  ;;  %v3638_v43 = vrot.slane %v3095_v23, 7 }
 0x1ce   : > { %v3283_v59 = vsel %vm746_vm1, %v3637_v1, %v745_v12  ;;  %v792_v60 = vmul.f32 %v3004_v45, %v3277_v62  ;;  %v3639_v40 = vrot.slane %v3095_v23, 1  ;;  %v821_v46 = vmul.f32 %v3010_v47, %v3095_v23  ;;  %1142 = vrot.lane.b32.xlu0 %v1085_v5, %s2667_s29 }
 0x1cf   : > { %v862_v11 = vmul.f32 %v3015_v51, %v3283_v59  ;;  %v723_v16 = vsel %vm717_vm0, %v714_v50, %v3638_v43  ;;  %v1013_v45 = vmul.f32 %v3035_v61, %v3154_v28  ;;  %v1044_v17 = vmul.f32 %v3021_v55, %v3120_v22  ;;  %1099 = vrot.lane.b32.xlu1 %v872_v32, %s2666_s27  ;;  %v3644_v43 = vld [vmem:[#allocation20_spill] sm:$0xff] }
 0x1d0   : > { %v3299_v12 = vsel %vm746_vm1, %v3639_v40, %v743_v33  ;;  %v831_v51 = vadd.f32 %v823_v21, %v792_v60  ;;  %v731_v10 = vsel %vm692_vm3, %v723_v16, 0.0  ;;  %v1083_v47 = vmul.f32 %v3044_v3, %v3166_v26  ;;  %v3641_v21 = vld [vmem:[#allocation31_spill] sm:$0xff]  ;;  %v3643_v60 = vld [vmem:[#allocation28_spill] sm:$0xff]  ;;  %v3645_v40 = vld [vmem:[#allocation33_spill] sm:$0xff] }
 0x1d1   : > { %v860_v50 = vmul.f32 %v3029_v57, %v3299_v12  ;;  %v790_v33 = vmul.f32 %v3026_v56, %v731_v10  ;;  %v1008_v61 = vmul.f32 %v3032_v58, %v731_v10  ;;  %v1039_v38 = vmul.f32 %v3018_v52, %v3095_v23 }
 0x1d2   : > { %v870_v35 = vadd.f32 %v862_v11, %v831_v51  ;;  %v1052_v2 = vadd.f32 %v1044_v17, %v1013_v45  ;;  %v1078_v57 = vmul.f32 %v3041_v0, %v3299_v12  ;;  %v1014_v55 = vmul.f32 %v3054_v7, %v3199_v34  ;;  %1150 = vrot.lane.b32.xlu0 %v1087_v24, %s2667_s29  ;;  %v3642_v24 = vld [vmem:[#allocation21_spill] sm:$0xff]  ;;  %v3647_v45 = vld [vmem:[#allocation32_spill] sm:$0xff] }
 0x1d3   : > { %v829_v18 = vadd.f32 %v821_v46, %v790_v33  ;;  %v1047_v48 = vadd.f32 %v1039_v38, %v1008_v61  ;;  %v1045_v56 = vmul.f32 %v3047_v4, %v3136_v53  ;;  %v1084_v3 = vmul.f32 %v3057_v8, %v3214_v15  ;;  %1148 = vrot.lane.b32.xlu1 %v1090_v30, %s2667_s29  ;;  %v3646_v46 = vld [vmem:[#allocation26_spill] sm:$0xff]  ;;  %v3648_v51 = vld [vmem:[#allocation25_spill] sm:$0xff]  ;;  %v3651_v61 = vld [vmem:[#allocation23_spill] sm:$0xff] }
 0x1d4   : > { %v1091_v58 = vadd.f32 %v1083_v47, %v1052_v2  ;;  %v1010_v52 = vmul.f32 %v3054_v7, %v3277_v62  ;;  %v1041_v0 = vmul.f32 %v3047_v4, %v3102_v29  ;;  %v959_v5 = vrot.slane %v3037_v63, %v2937_v39  ;;  %v3640_v4 = vld [vmem:[#allocation22_spill] sm:$0xff] }
 0x1d5   : > { %v868_v19 = vadd.f32 %v860_v50, %v829_v18  ;;  %v1086_v54 = vadd.f32 %v1078_v57, %v1047_v48  ;;  %v1053_v25 = vadd.f32 %v1045_v56, %v1014_v55  ;;  %v955_v42 = vrot.slane %v3037_v63, %v2940_v41  ;;  %v3649_v50 = vld [vmem:[#allocation29_spill] sm:$0xff]  ;;  %v3652_v56 = vld [vmem:[#allocation24_spill] sm:$0xff] }
 0x1d6   : > { %v1049_v36 = vadd.f32 %v1041_v0, %v1010_v52  ;;  %v1080_v9 = vmul.f32 %v3057_v8, %v3283_v59  ;;  %v905_v7 = vmul.f32 %v3075_v14, %v3199_v34  ;;  %v936_v32 = vmul.f32 %v3640_v4, %v3136_v53 }
 0x1d7   : > { %v1092_v1 = vadd.f32 %v1084_v3, %v1053_v25  ;;  %v933_v30 = vmul.f32 %v3642_v24, %v3641_v21  ;;  %v975_v11 = vmul.f32 %v3643_v60, %v3214_v15  ;;  %v916_v63 = vrot.slane %v3644_v43, %v2940_v41  ;;  %1097 = vrot.lane.b32.xlu0 %v868_v19, %s2666_s27  ;;  %v3650_v15 = vld [vmem:[#allocation30_spill] sm:$0xff] }
 0x1d8   : > { %v1088_v16 = vadd.f32 %v1080_v9, %v1049_v36  ;;  %v944_v8 = vadd.f32 %v936_v32, %v905_v7  ;;  %v972_v34 = vmul.f32 %v3646_v46, %v3645_v40  ;;  %v902_v53 = vmul.f32 %v3648_v51, %v3647_v45  ;;  %1105 = vrot.lane.b32.xlu1 %v870_v35, %s2666_s27  ;;  %s2576_s27 = sshll.u32 %s2669_s25, 4  ;;  %s2577_s27 = int_to_ptr.vmem [resolvable:$false] %s2576_s27 }
 0x1d9   : > { %v903_v17 = vmul.f32 %v3649_v50, %v3240_v31  ;;  %v904_v33 = vmul.f32 %v3650_v15, %v3154_v28  ;;  %v934_v47 = vmul.f32 %v916_v63, %v3129_v6  ;;  %v935_v38 = vmul.f32 %v3651_v61, %v3120_v22  ;;  %p2579_p4 = scmp.lt.s32.totalorder %s3519_s26, %s2577_s27 }
 0x1da   : > { %v3362_v2 = vadd.f32 %v975_v11, %v944_v8  ;;  %v941_v57 = vadd.f32 %v933_v30, %v902_v53  ;;  %v973_v55 = vmul.f32 %v955_v42, %v3256_v44  ;;  %v974_v18 = vmul.f32 %v959_v5, %v3166_v26  ;;  %v1192_v11 = vld [vmem:[#allocation9 + $0x22] ss:$8 sm:$0xf] }
 0x1db   : > { %v942_v48 = vadd.f32 %v934_v47, %v903_v17  ;;  %v943_v35 = vadd.f32 %v935_v38, %v904_v33  ;;  %1146 = vrot.lane.b32.xlu0 %v1086_v54, %s2667_s29  ;;  %v898_v28 = vmul.f32 %v3648_v51, %v3180_v20  ;;  %v901_v6 = vmul.f32 %v3075_v14, %v3277_v62  ;;  %v3653_v54 = vld [vmem:[#allocation27_spill] sm:$0xff] }
 0x1dc   : > { %v980_v31 = vadd.f32 %v972_v34, %v941_v57  ;;  %v929_v22 = vmul.f32 %v3642_v24, %v3652_v56  ;;  %1152 = vrot.lane.b32.xlu1 %v1091_v58, %s2667_s29  ;;  %v932_v26 = vmul.f32 %v3640_v4, %v3102_v29  ;;  %v968_v0 = vmul.f32 %v3646_v46, %v3184_v49 }
 0x1dd   : > { %v981_v3 = vadd.f32 %v973_v55, %v942_v48  ;;  %v3374_v44 = vadd.f32 %v974_v18, %v943_v35  ;;  %v899_v20 = vmul.f32 %v3649_v50, %v731_v10  ;;  %v900_v14 = vmul.f32 %v3650_v15, %v3220_v27 }
 0x1de   : > { %v937_v52 = vadd.f32 %v929_v22, %v898_v28  ;;  %v940_v62 = vadd.f32 %v932_v26, %v901_v6  ;;  %v971_v19 = vmul.f32 %v3643_v60, %v3283_v59  ;;  %v930_v58 = vmul.f32 %v916_v63, %v3095_v23 }
 0x1df   : > { %v931_v25 = vmul.f32 %v3651_v61, %v3653_v54  ;;  %1154 = vrot.lane.b32.xlu0 %v1088_v16, %s2667_s29  ;;  %v969_v36 = vmul.f32 %v955_v42, %v3299_v12  ;;  %v970_v27 = vmul.f32 %v959_v5, %v3209_v13  ;;  %v3654_v21 = vlaneseq  ;;  %v3655_v16 = vld [vmem:[#allocation18_spill] sm:$0xff] }
 0x1e0   : > { %v976_v29 = vadd.f32 %v968_v0, %v937_v52  ;;  %1156 = vrot.lane.b32.xlu1 %v1092_v1, %s2667_s29  ;;  %v979_v49 = vadd.f32 %v971_v19, %v940_v62  ;;  %v938_v10 = vadd.f32 %v930_v58, %v899_v20  ;;  %v1197_v8 = vrot.slane %v1192_v11, %v3655_v16  ;;  %v3656_v19 = vld [vmem:[#allocation19_spill] sm:$0xff]  ;;  %s2578_s29 = scalar_lea.vmem %s2577_s27, 512 }
 0x1e1   : > { %v939_v9 = vadd.f32 %v931_v25, %v900_v14  ;;  %v3393_v24 = vand.u32 127, %v3654_v21  ;;  %v1201_v33 = vrot.slane %v1192_v11, %v2940_v41  ;;  %v1205_v55 = vrot.slane %v1192_v11, %v2937_v39  ;;  %p2580_p8 = scmp.lt.s32.totalorder %s2578_s29, %s2572_s7 }
 0x1e2   : > { %v977_v7 = vadd.f32 %v969_v36, %v938_v10  ;;  %v1209_v58 = vrot.slane %v1192_v11, %v3656_v19 }
 0x1e3   : > { %v978_v4 = vadd.f32 %v970_v27, %v939_v9  ;;  %vm1109_vm4 = vcmp.lt.s32.totalorder %v3393_v24, 32  ;;  %vm701_vm5 = vcmp.ge.s32.totalorder %v3393_v24, 32  ;;  %vm1158_vm6 = vcmp.lt.s32.totalorder %v3393_v24, 96  ;;  %p2581_p3 = por %p2580_p8, %p2579_p4 }
 0x1e4   : > { %v700_v47 = vadd.s32 384, %v3393_v24 }
 0x1e5   : > { %p2582_p7 = pnand %p2581_p3, %p2575_p9 }
 0x1e6   : > { %vm708_vm7 = vcmp.lt.s32.totalorder %v700_v47, 480 }
 0x234   : > { %v1096_v59 = vpop.permute.xlu0 %1095 }
 0x235   : > { %v1104_v32 = vpop.permute.xlu1 %1103 }
 0x238   : > { %v1094_v23 = vpop.permute.xlu0 %1093 }
 0x239   : > { %v1145_v30 = vpop.permute.xlu1 %1144 }
 0x23c   : > { %v1102_v60 = vpop.permute.xlu0 %1101 }
 0x23d   : > { %v1108_v12 = vpop.permute.xlu1 %1107 }
 0x23e   : > { %v1117_v42 = vsel %vm1109_vm4, %v1108_v12, %v1096_v59  ;;  %v1111_v61 = vsel %vm1109_vm4, %v1104_v32, %v1108_v12 }
 0x23f   : > { %v1130_v5 = vsel %vm701_vm5, %v1117_v42, 0.0  ;;  %v1141_v14 = vadd.f32 %v1111_v61, %v3362_v2 }
 0x240   : > { %v1143_v1 = vpop.permute.xlu0 %1142  ;;  %v1138_v63 = vadd.f32 %v1130_v5, %v980_v31 }
 0x241   : > { %v1100_v13 = vpop.permute.xlu1 %1099 }
 0x242   : > { %v1115_v51 = vsel %vm1109_vm4, %v1096_v59, %v1100_v13  ;;  %v1113_v18 = vsel %vm1109_vm4, %v1100_v13, %v1104_v32 }
 0x243   : > { %v1139_v48 = vadd.f32 %v1115_v51, %v981_v3  ;;  %v1140_v54 = vadd.f32 %v1113_v18, %v3374_v44 }
 0x244   : > { %v1151_v43 = vpop.permute.xlu0 %1150 }
 0x245   : > { %v1149_v40 = vpop.permute.xlu1 %1148 }
 0x246   : > { %v1164_v46 = vsel %vm1158_vm6, %v1145_v30, %v1149_v40 }
 0x247   : > { %v1187_v34 = vadd.f32 %v1164_v46, %v1138_v63 }
 0x249   : > { %v1098_v45 = vpop.permute.xlu0 %1097  ;;  %v3407_v53 = vadd.f32 %v1197_v8, %v1187_v34 }
 0x24a   : > { %v1106_v50 = vpop.permute.xlu1 %1105  ;;  %v1114_v17 = vsel %vm1109_vm4, %v1094_v23, %v1098_v45  ;;  %v1112_v56 = vsel %vm1109_vm4, %v1098_v45, %v1102_v60 }
 0x24b   : > { %v1116_v15 = vsel %vm1109_vm4, %v1106_v50, %v1094_v23  ;;  %v2092_v38 = vmul.f32 -1.442695, %v3407_v53  ;;  %v1135_v31 = vadd.f32 %v1114_v17, %v977_v7  ;;  %v1110_v6 = vsel %vm1109_vm4, %v1102_v60, %v1106_v50 }
 0x24c   : > { %v1126_v57 = vsel %vm701_vm5, %v1116_v15, 0.0  ;;  %v1136_v25 = vadd.f32 %v1112_v56, %v978_v4  ;;  %v1137_v9 = vadd.f32 %v1110_v6, %v979_v49 }
 0x24d   : > { %v1134_v35 = vadd.f32 %v1126_v57, %v976_v29  ;;  %v1147_v28 = vpop.permute.xlu0 %1146  ;;  %2397 = vpow2.f32 %v2092_v38 }
 0x24e   : > { %v1153_v22 = vpop.permute.xlu1 %1152  ;;  %v1161_v26 = vsel %vm1158_vm6, %v1147_v28, %v1151_v43  ;;  %v1163_v52 = vsel %vm1158_vm6, %v1143_v1, %v1147_v28 }
 0x24f   : > { %v1162_v3 = vsel %vm1158_vm6, %v1149_v40, %v1153_v22  ;;  %v1183_v0 = vadd.f32 %v1163_v52, %v1134_v35  ;;  %v1184_v20 = vadd.f32 %v1161_v26, %v1135_v31 }
 0x250   : > { %v1188_v62 = vadd.f32 %v1162_v3, %v1139_v48 }
 0x251   : > { %v1214_v29 = vadd.f32 %v1197_v8, %v1183_v0  ;;  %v3436_v36 = vadd.f32 %v1201_v33, %v1184_v20  ;;  %v1155_v10 = vpop.permute.xlu0 %1154 }
 0x252   : > { %v1219_v27 = vadd.f32 %v1201_v33, %v1188_v62  ;;  %v1157_v7 = vpop.permute.xlu1 %1156  ;;  %v1159_v59 = vsel %vm1158_vm6, %v1151_v43, %v1155_v10  ;;  %v1165_v2 = vsel %vm1158_vm6, %v1155_v10, %v1143_v1 }
 0x253   : > { %v2088_v32 = vmul.f32 -1.442695, %v1214_v29  ;;  %v2089_v23 = vmul.f32 -1.442695, %v3436_v36  ;;  %v1160_v44 = vsel %vm1158_vm6, %v1153_v22, %v1157_v7  ;;  %v1166_v4 = vsel %vm1158_vm6, %v1157_v7, %v1145_v30 }
 0x254   : > { %v2093_v21 = vmul.f32 -1.442695, %v1219_v27  ;;  %v1182_v49 = vsel %vm708_vm7, %v1166_v4, 0.0  ;;  %v1189_v60 = vadd.f32 %v1160_v44, %v1140_v54  ;;  %v1178_v12 = vsel %vm708_vm7, %v1165_v2, 0.0 }
 0x255   : > { %2399 = vpow2.f32 %v2088_v32  ;;  %v1190_v42 = vadd.f32 %v1182_v49, %v1141_v14  ;;  %v1185_v13 = vadd.f32 %v1159_v59, %v1136_v25  ;;  %v1186_v5 = vadd.f32 %v1178_v12, %v1137_v9  ;;  %v1413_v2 = vld [vmem:[#allocation9 + $0x24] ss:$8 sm:$0xf]  ;;  %v1309_v4 = vld [vmem:[#allocation9 + $0x23] ss:$8 sm:$0xf] }
 0x256   : > { %2401 = vpow2.f32 %v2093_v21  ;;  %v1220_v1 = vadd.f32 %v1205_v55, %v1189_v60 }
 0x257   : > { %2403 = vpow2.f32 %v2089_v23  ;;  %v1221_v11 = vadd.f32 %v1209_v58, %v1190_v42  ;;  %v1216_v43 = vadd.f32 %v1205_v55, %v1185_v13  ;;  %v1217_v63 = vadd.f32 %v1209_v58, %v1186_v5  ;;  %v2398_v40 = vpop.eup %2397 }
 0x258   : > { %v2094_v8 = vmul.f32 -1.442695, %v1220_v1  ;;  %v1250_v34 = vadd.f32 1.0, %v2398_v40  ;;  %v1418_v13 = vrot.slane %v1413_v2, %v3655_v16  ;;  %v1422_v5 = vrot.slane %v1413_v2, %v2940_v41 }
 0x259   : > { %v2095_v24 = vmul.f32 -1.442695, %v1221_v11  ;;  %v2090_v30 = vmul.f32 -1.442695, %v1216_v43  ;;  %v2091_v46 = vmul.f32 -1.442695, %v1217_v63 }
 0x25a   : > { %2405 = vpow2.f32 %v2094_v8  ;;  %v1318_v8 = vrot.slane %v1309_v4, %v2940_v41 }
 0x25b   : > { %2407 = vpow2.f32 %v2095_v24 }
 0x25c   : > { %2409 = vpow2.f32 %v2090_v30 }
 0x25d   : > { %2411 = vpow2.f32 %v2091_v46 }
 0x25e   : > { %2413 = vrcp.f32 %v1250_v34 }
 0x25f   : > { %v2400_v45 = vpop.eup %2399 }
 0x260   : > { %v2402_v51 = vpop.eup %2401  ;;  %v1246_v50 = vadd.f32 1.0, %v2400_v45 }
 0x261   : > { %v2404_v17 = vpop.eup %2403  ;;  %v1251_v15 = vadd.f32 1.0, %v2402_v51 }
 0x262   : > { %v1247_v33 = vadd.f32 1.0, %v2404_v17  ;;  %2415 = vrcp.f32 %v1246_v50 }
 0x263   : > { %2417 = vrcp.f32 %v1251_v15 }
 0x264   : > { %v2406_v47 = vpop.eup %2405  ;;  %2419 = vrcp.f32 %v1247_v33 }
 0x265   : > { %v1252_v61 = vadd.f32 1.0, %v2406_v47  ;;  %v2408_v38 = vpop.eup %2407  ;;  %v1426_v47 = vrot.slane %v1413_v2, %v2937_v39 }
 0x266   : > { %v2410_v57 = vpop.eup %2409  ;;  %v1253_v55 = vadd.f32 1.0, %v2408_v38 }
 0x267   : > { %2421 = vrcp.f32 %v1252_v61  ;;  %v2412_v18 = vpop.eup %2411  ;;  %v1248_v48 = vadd.f32 1.0, %v2410_v57  ;;  %v1322_v61 = vrot.slane %v1309_v4, %v2937_v39  ;;  %v1430_v57 = vrot.slane %v1413_v2, %v3656_v19 }
 0x268   : > { %2423 = vrcp.f32 %v1253_v55  ;;  %v1249_v35 = vadd.f32 1.0, %v2412_v18  ;;  %v2414_v31 = vpop.eup %2413  ;;  %v1326_v18 = vrot.slane %v1309_v4, %v3656_v19 }
 0x269   : > { %2425 = vrcp.f32 %v1248_v48  ;;  %v3450_v56 = vmul.f32 %v2414_v31, %v3407_v53 }
 0x26a   : > { %2427 = vrcp.f32 %v1249_v35 }
 0x26c   : > { %v2416_v28 = vpop.eup %2415 }
 0x26d   : > { %v2418_v6 = vpop.eup %2417  ;;  %v3452_v22 = vmul.f32 %v2416_v28, %v1214_v29 }
 0x26e   : > { %v2420_v26 = vpop.eup %2419  ;;  %v3454_v52 = vmul.f32 %v2418_v6, %v1219_v27 }
 0x26f   : > { %v3457_v3 = vmul.f32 %v2420_v26, %v3436_v36  ;;  %v1278_v0 = vadd.f32 %v3450_v56, %v3452_v22 }
 0x271   : > { %v2422_v20 = vpop.eup %2421  ;;  %v1279_v14 = vrot.slane %v1278_v0, 4  ;;  %v1285_v62 = vadd.f32 %v3454_v52, %v3457_v3 }
 0x272   : > { %v2424_v58 = vpop.eup %2423  ;;  %v3463_v25 = vmul.f32 %v2422_v20, %v1220_v1  ;;  %v1314_v1 = vrot.slane %v1309_v4, %v3655_v16  ;;  %v2335_v4 = vld [vmem:[#allocation8] sm:$0xff]  }
 0x273   : > { %v1280_v54 = vadd.f32 %v1279_v14, %v1278_v0  ;;  %v1286_v53 = vrot.slane %v1285_v62, 4  ;;  %v2426_v29 = vpop.eup %2425  ;;  %v3465_v10 = vmul.f32 %v2424_v58, %v1221_v11 }
 0x274   : > { %v2428_v9 = vpop.eup %2427  ;;  %v3467_v7 = vmul.f32 %v2426_v29, %v1216_v43 }
 0x275   : > { %v1281_v27 = vrot.slane %v1280_v54, 2  ;;  %v1287_v36 = vadd.f32 %v1286_v53, %v1285_v62  ;;  %v3469_v59 = vmul.f32 %v2428_v9, %v1217_v63 }
 0x276   : > { %v1292_v23 = vadd.f32 %v3463_v25, %v3467_v7 }
 0x277   : > { %v1288_v32 = vrot.slane %v1287_v36, 2  ;;  %v1282_v44 = vadd.f32 %v1281_v27, %v1280_v54  ;;  %v1299_v21 = vadd.f32 %v3465_v10, %v3469_v59 }
 0x278   : > { %v1293_v49 = vrot.slane %v1292_v23, 4 }
 0x279   : > { %v1283_v60 = vrot.slane %v1282_v44, 1  ;;  %v1289_v12 = vadd.f32 %v1288_v32, %v1287_v36  ;;  %v1300_v42 = vrot.slane %v1299_v21, 4 }
 0x27a   : > { %v1294_v11 = vadd.f32 %v1293_v49, %v1292_v23  ;;  %v2333_v23 = vld [vmem:[#allocation8 + $0x40] sm:$0xff]   ;;  %v2337_v49 = vld [vmem:[#allocation8 + $0x48] sm:$0xff]  }
 0x27b   : > { %v1284_v43 = vadd.f32 %v1283_v60, %v1282_v44  ;;  %v1290_v63 = vrot.slane %v1289_v12, 1  ;;  %v1301_v40 = vadd.f32 %v1300_v42, %v1299_v21  ;;  %v2334_v44 = vld [vmem:[#allocation8 + $0xc0] sm:$0xff]   ;;  %v2338_v60 = vld [vmem:[#allocation8 + $0xc8] sm:$0xff]   ;;  %2140 = vmatprep.subr.bf16.mxu0 %v2333_v23 }
 0x27c   : > { %v1295_v30 = vrot.slane %v1294_v11, 2  ;;  %v2336_v21 = vld [vmem:[#allocation8 + $0x80] sm:$0xff]   ;;  %2162 = vmatprep.subr.bf16.mxu1 %v2334_v44  ;;  %2141 = vmatpush3.bf16.msra.mxu0 %v2335_v4  ;;  %v2340_v42 = vld [vmem:[#allocation8 + $0x88] sm:$0xff]  }
 0x27d   : > { %v1291_v24 = vadd.f32 %v1290_v63, %v1289_v12  ;;  %v1302_v46 = vrot.slane %v1301_v40, 2  ;;  %v1435_v34 = vmul.f32 %v1418_v13, %v1284_v43  ;;  %v1331_v50 = vmul.f32 %v1314_v1, %v1284_v43  ;;  %2163 = vmatpush3.bf16.msra.mxu1 %v2336_v21  ;;  %v2339_v12 = vld [vmem:[#allocation8 + $0x8] sm:$0xff]   ;;  %2142 = vmatprep.subr.bf16.mxu0 %v2337_v49  ;;  %v2341_v13 = vld [vmem:[#allocation8 + $0x50] sm:$0xff]   ;;  %v2345_v43 = vld [vmem:[#allocation8 + $0x58] sm:$0xff]  }
 0x27e   : > { %v1296_v45 = vadd.f32 %v1295_v30, %v1294_v11  ;;  %2164 = vmatprep.subr.bf16.mxu1 %v2338_v60  ;;  %v2343_v1 = vld [vmem:[#allocation8 + $0x10] sm:$0xff]   ;;  %v2346_v63 = vld [vmem:[#allocation8 + $0xd8] sm:$0xff]   ;;  %v2350_v30 = vld [vmem:[#allocation8 + $0xe0] sm:$0xff]  }
 0x27f   : > { %v1436_v51 = vmul.f32 %v1422_v5, %v1291_v24  ;;  %v1332_v17 = vmul.f32 %v1318_v8, %v1291_v24  ;;  %v1303_v15 = vadd.f32 %v1302_v46, %v1301_v40  ;;  %v1439_v55 = vsel %vm1335_vm8, %v1435_v34, 0.0  ;;  %v2342_v5 = vld [vmem:[#allocation8 + $0xd0] sm:$0xff]   ;;  %v2347_v8 = vld [vmem:[#allocation8 + $0x18] sm:$0xff]   ;;  %v2349_v24 = vld [vmem:[#allocation8 + $0x60] sm:$0xff]  }
 0x280   : > { %v1297_v33 = vrot.slane %v1296_v45, 1  ;;  %v1336_v31 = vsel %vm1335_vm8, %v1331_v50, 0.0  ;;  %2143 = vmatpush3.bf16.msra.mxu0 %v2339_v12  ;;  %v2344_v11 = vld [vmem:[#allocation8 + $0x90] sm:$0xff]   ;;  %v2348_v40 = vld [vmem:[#allocation8 + $0x98] sm:$0xff]   ;;  %v2351_v46 = vld [vmem:[#allocation8 + $0x20] sm:$0xff]  }
 0x281   : > { %v1304_v38 = vrot.slane %v1303_v15, 1  ;;  %v1440_v35 = vsel %vm1335_vm8, %v1436_v51, 0.0  ;;  %v1337_v28 = vsel %vm1335_vm8, %v1332_v17, 0.0  ;;  %2165 = vmatpush3.bf16.msra.mxu1 %v2340_v42  ;;  %2144 = vmatprep.subr.bf16.mxu0 %v2341_v13  ;;  %v2352_v34 = vld [vmem:[#allocation8 + $0xa0] sm:$0xff]   ;;  %v2354_v51 = vld [vmem:[#allocation8 + $0xe8] sm:$0xff]  }
 0x282   : > { %v1298_v48 = vadd.f32 %v1297_v33, %v1296_v45  ;;  %v1441_v14 = vadd.f32 %v1440_v35, %v1439_v55  ;;  %v1338_v58 = vadd.f32 %v1337_v28, %v1336_v31  ;;  %2166 = vmatprep.subr.bf16.mxu1 %v2342_v5  ;;  %v2353_v45 = vld [vmem:[#allocation8 + $0x68] sm:$0xff]   ;;  %v2358_v33 = vld [vmem:[#allocation8 + $0xf0] sm:$0xff]   ;;  %v2363_v55 = vld [vmem:[#allocation8 + $0x38] sm:$0xff]   ;;  %v1346_v35 = vstv %s1345_s20 }
 0x283   : > { %v1305_v6 = vadd.f32 %v1304_v38, %v1303_v15  ;;  %v2355_v50 = vld [vmem:[#allocation8 + $0x28] sm:$0xff]   ;;  %v2357_v15 = vld [vmem:[#allocation8 + $0x70] sm:$0xff]   ;;  %v2361_v38 = vld [vmem:[#allocation8 + $0x78] sm:$0xff]  }
 0x284   : > { %v1437_v26 = vmul.f32 %v1426_v47, %v1298_v48  ;;  %v1333_v0 = vmul.f32 %v1322_v61, %v1298_v48  ;;  %2145 = vmatpush3.bf16.msra.mxu0 %v2343_v1  ;;  %v2356_v17 = vld [vmem:[#allocation8 + $0xa8] sm:$0xff]   ;;  %v2359_v47 = vld [vmem:[#allocation8 + $0x30] sm:$0xff]   ;;  %v1449_v48 = vstv %s2097_s19 }
 0x285   : > { %v1438_v20 = vmul.f32 %v1430_v57, %v1305_v6  ;;  %v1334_v62 = vmul.f32 %v1326_v18, %v1305_v6  ;;  %2167 = vmatpush3.bf16.msra.mxu1 %v2344_v11  ;;  %2146 = vmatprep.subr.bf16.mxu0 %v2345_v43  ;;  %v2360_v61 = vld [vmem:[#allocation8 + $0xb0] sm:$0xff]   ;;  %v2362_v57 = vld [vmem:[#allocation8 + $0xf8] sm:$0xff]  }
 0x286   : > { %v1442_v54 = vsel %vm1335_vm8, %v1437_v26, 0.0  ;;  %v1339_v53 = vsel %vm1335_vm8, %v1333_v0, 0.0  ;;  %2168 = vmatprep.subr.bf16.mxu1 %v2346_v63  ;;  %v2364_v18 = vld [vmem:[#allocation8 + $0xb8] sm:$0xff]  }
 0x287   : > { %v1443_v29 = vadd.f32 %v1442_v54, %v1441_v14  ;;  %v1444_v9 = vsel %vm1335_vm8, %v1438_v20, 0.0  ;;  %v1340_v27 = vadd.f32 %v1339_v53, %v1338_v58  ;;  %v1341_v36 = vsel %vm1335_vm8, %v1334_v62, 0.0 }
 0x288   : > { %2147 = vmatpush3.bf16.msra.mxu0 %v2347_v8  ;;  %v2668_v53 = vmov 1966171168  }
 0x289   : > { %v1445_v2 = vadd.f32 %v1444_v9, %v1443_v29  ;;  %v1342_v32 = vadd.f32 %v1341_v36, %v1340_v27  ;;  %2169 = vmatpush3.bf16.msra.mxu1 %v2348_v40  ;;  %2148 = vmatprep.subr.bf16.mxu0 %v2349_v24  ;;  %v1389_v29 = vunpack.c.l.s4 %v2668_v53  ;;  %v1459_v9 = vld [vmem:[#allocation9 + $0x26] ss:$8 sm:$0xf]  ;;  %v1356_v27 = vld [vmem:[#allocation9 + $0x25] ss:$8 sm:$0xf] }
 0x28a   : > { %2170 = vmatprep.subr.bf16.mxu1 %v2350_v30  ;;  %v1472_v23 = vrot.slane %v1459_v9, %v2937_v39  ;;  %v1476_v44 = vrot.slane %v1459_v9, %v3656_v19  ;;  %v1361_v21 = vrot.slane %v1356_v27, %v3655_v16  ;;  %v1365_v49 = vrot.slane %v1356_v27, %v2940_v41 }
 0x28b   : > { %1446 = vadd.xlane.f32.xlu1 %v1445_v2  ;;  %1343 = vadd.xlane.f32.xlu0 %v1342_v32  ;;  %v1390_v36 = vunpack.c.0.s8 %v1389_v29  ;;  %v1464_v2 = vrot.slane %v1459_v9, %v3655_v16  ;;  %v1468_v32 = vrot.slane %v1459_v9, %v2940_v41  ;;  %v1369_v60 = vrot.slane %v1356_v27, %v2937_v39 }
 0x28c   : > { %2149 = vmatpush3.bf16.msra.mxu0 %v2351_v46  ;;  %v1373_v12 = vrot.slane %v1356_v27, %v3656_v19 }
 0x28d   : > { %2171 = vmatpush3.bf16.msra.mxu1 %v2352_v34  ;;  %2150 = vmatprep.subr.bf16.mxu0 %v2353_v45  ;;  %v1393_v5 = vsub.s32 %v1390_v36, %v2931_v37  ;;  %v1307_v37 = vld [vmem:[#allocation9 + $0x27] ss:$8 sm:$0xf] }
 0x28e   : > { %2172 = vmatprep.subr.bf16.mxu1 %v2354_v51 }
 0x290   : > { %2151 = vmatpush3.bf16.msra.mxu0 %v2355_v50 }
 0x291   : > { %2173 = vmatpush3.bf16.msra.mxu1 %v2356_v17  ;;  %2152 = vmatprep.subr.bf16.mxu0 %v2357_v15 }
 0x292   : > { %2174 = vmatprep.subr.bf16.mxu1 %v2358_v33 }
 0x294   : > { %2153 = vmatpush3.bf16.msra.mxu0 %v2359_v47 }
 0x295   : > { %2175 = vmatpush3.bf16.msra.mxu1 %v2360_v61  ;;  %2154 = vmatprep.subr.bf16.mxu0 %v2361_v38 }
 0x296   : > { %2176 = vmatprep.subr.bf16.mxu1 %v2362_v57 }
 0x298   : > { %2155 = vmatpush3.bf16.msra.mxu0 %v2363_v55 }
 0x299   : > { %2177 = vmatpush3.bf16.msra.mxu1 %v2364_v18 }
 0x318   : > { %v1447_v31 = vpop.xlane.xlu1 %1446  ;;  %v1344_v28 = vpop.xlane.xlu0 %1343 }
 0x319   : > { %v1450_v6 = vadd.f32 %v1449_v48, %v1447_v31  ;;  %v1347_v26 = vadd.f32 %v1346_v35, %v1344_v28 }
 0x31b   : > { %v2098_v0 = vmul.f32 -1.442695, %v1450_v6  ;;  %v2096_v20 = vmul.f32 -1.442695, %v1347_v26 }
 0x31d   : > { %2429 = vpow2.f32 %v2098_v0 }
 0x31e   : > { %2431 = vpow2.f32 %v2096_v20 }
 0x327   : > { %v2430_v14 = vpop.eup %2429 }
 0x328   : > { %v2432_v62 = vpop.eup %2431  ;;  %v1454_v58 = vadd.f32 1.0, %v2430_v14 }
 0x329   : > { %v1351_v54 = vadd.f32 1.0, %v2432_v62 }
 0x32a   : > { %2433 = vrcp.f32 %v1454_v58 }
 0x32b   : > { %2435 = vrcp.f32 %v1351_v54 }
 0x334   : > { %v2434_v4 = vpop.eup %2433 }
 0x335   : > { %v2436_v42 = vpop.eup %2435  ;;  %v1457_v13 = vmul.f32 %v2434_v4, %v1450_v6 }
 0x336   : > { %v1354_v1 = vmul.f32 %v2436_v42, %v1347_v26 }
 0x337   : > { %v1481_v11 = vmul.f32 %v1464_v2, %v1457_v13  ;;  %v1482_v43 = vmul.f32 %v1468_v32, %v1457_v13  ;;  %v1483_v63 = vmul.f32 %v1472_v23, %v1457_v13  ;;  %v1484_v8 = vmul.f32 %v1476_v44, %v1457_v13 }
 0x338   : > { %v1378_v40 = vmul.f32 %v1361_v21, %v1354_v1  ;;  %v1379_v24 = vmul.f32 %v1365_v49, %v1354_v1  ;;  %v1380_v30 = vmul.f32 %v1369_v60, %v1354_v1  ;;  %v1381_v46 = vmul.f32 %v1373_v12, %v1354_v1  ;;  %v2441_v12 = vld [vmem:[%s2910_s14] sm:$0xff] }
 0x339   : > { %v1489_v34 = vcombine.low %v1481_v11, %v1482_v43  ;;  %v1490_v45 = vcombine.low %v1483_v63, %v1484_v8 }
 0x33a   : > { %v1386_v51 = vcombine.low %v1378_v40, %v1379_v24  ;;  %v1387_v50 = vcombine.low %v1380_v30, %v1381_v46 }
 0x33b   : > { %v1497_v17 = vrot.slane %v1489_v34, %v1393_v5  ;;  %v1504_v15 = vrot.slane %v1490_v45, %v1393_v5 }
 0x33c   : > { %v1394_v33 = vrot.slane %v1386_v51, %v1393_v5  ;;  %v1401_v47 = vrot.slane %v1387_v50, %v1393_v5 }
 0x33d   : > { %v1505_v61 = vcombine.low %v1497_v17, %v1504_v15 }
 0x33e   : > { %v1402_v38 = vcombine.low %v1394_v33, %v1401_v47 }
 0x33f   : > { %v1512_v55 = vrot.slane %v1505_v61, %v1393_v5 }
 0x340   : > { %v1409_v57 = vrot.slane %v1402_v38, %v1393_v5  ;;  %v2442_v5 = vld [vmem:[%s2910_s14 + $0x8] sm:$0xff] }
 0x342   : > { %v1411_v18 = vadd.f32 %v1409_v57, %v1307_v37 }
 0x344   : > { %v1514_v48 = vadd.f32 %v1512_v55, %v1411_v18 }
 0x346   : > { %v2099_v35 = vmul.f32 -1.442695, %v1514_v48 }
 0x348   : > { %2437 = vpow2.f32 %v2099_v35 }
 0x352   : > { %v2438_v31 = vpop.eup %2437 }
 0x353   : > { %v1518_v28 = vadd.f32 1.0, %v2438_v31 }
 0x355   : > { %2439 = vrcp.f32 %v1518_v28 }
 0x35f   : > { %v2440_v6 = vpop.eup %2439 }
 0x360   : > { %v1529_v26 = vrot.slane %v2440_v6, %v2940_v41  ;;  %v1537_v0 = vrot.slane %v2440_v6, %v3656_v19  ;;  %v1525_v20 = vrot.slane %v2440_v6, %v3655_v16  ;;  %v1533_v14 = vrot.slane %v2440_v6, %v2937_v39 }
 0x362   : > { %v1543_v62 = vmul.f32 %v1529_v26, %v3457_v3  ;;  %v1547_v58 = vmul.f32 %v1529_v26, %v3454_v52  ;;  %v1545_v54 = vmul.f32 %v1537_v0, %v3469_v59  ;;  %v1549_v53 = vmul.f32 %v1537_v0, %v3465_v10 }
 0x363   : > { %v1542_v29 = vmul.f32 %v1525_v20, %v3452_v22  ;;  %v1546_v9 = vmul.f32 %v1525_v20, %v3450_v56  ;;  %v1544_v41 = vmul.f32 %v1533_v14, %v3467_v7  ;;  %v1548_v19 = vmul.f32 %v1533_v14, %v3463_v25  ;;  %v2100_v22 = vld [vmem:[%s3573_s4] ss:$0 sm:$0xff] }
 0x364   : > { %v1551_v27 = vpack.c.bf16 %v1547_v58, %v1543_v62  ;;  %v1553_v16 = vpack.c.bf16 %v1549_v53, %v1545_v54 }
 0x365   : > { %v1550_v36 = vpack.c.bf16 %v1546_v9, %v1542_v29  ;;  %v1552_v39 = vpack.c.bf16 %v1548_v19, %v1544_v41 }
 0x366   : > { %1849 = vmatprep.mubr.bf16.mxu0 %v1551_v27  ;;  %1890 = vmatprep.mubr.bf16.mxu1 %v1553_v16 }
 0x367   : > { %1850 = vmatmul.mubr.bf16.vlgmr.msra.gmra.mrb[4].mxu0 %v1550_v36  ;;  %1891 = vmatmul.mubr.bf16.vlgmr.msra.gmra.mrb[4].mxu1 %v1552_v39 }
 0x43a   : > { %v2156_v52 = vpop.f32.mrb[4].mxu0  ;;  %v2178_v3 = vpop.f32.mrb[4].mxu1 }
 0x43b   : > { %v2157_v56 = vpop.f32.mrb[5].mxu0  ;;  %v2179_v10 = vpop.f32.mrb[5].mxu1 }
 0x43c   : > { %v2158_v25 = vadd.f32 %v2157_v56, %v2156_v52  ;;  %v2180_v7 = vadd.f32 %v2179_v10, %v2178_v3  ;;  %v2159_v59 = vpop.f32.mrb[6].mxu0  ;;  %v2181_v2 = vpop.f32.mrb[6].mxu1 }
 0x43d   : > { %v2160_v32 = vpop.f32.mrb[7].mxu0  ;;  %v2182_v23 = vpop.f32.mrb[7].mxu1 }
 0x43e   : > { %v1852_v44 = vadd.f32 %v2158_v25, %v2100_v22  ;;  %v2161_v4 = vadd.f32 %v2160_v32, %v2159_v59  ;;  %v2183_v21 = vadd.f32 %v2182_v23, %v2181_v2 }
 0x440   : > { %v1893_v49 = vadd.f32 %v2180_v7, %v1852_v44  ;;  %v1855_v60 = vadd.f32 %v2161_v4, %v2100_v22 }
 0x442   : > { %v1899_v42 = vadd.f32 %v2441_v12, %v1893_v49  ;;  %v1896_v13 = vadd.f32 %v2183_v21, %v1855_v60 }
 0x444   : > { %1901 = vst [vmem:[%s327_s18] sm:$0xff] %v1899_v42  ;;  %v1900_v1 = vadd.f32 %v2442_v5, %v1896_v13 }
 0x446   : > { %1902 = vst [vmem:[%s327_s18 + $0x8] sm:$0xff] %v1900_v1 }
 0x447   : > { %2585 = shalt.err (!%p2582_p7)
}
 0x448   : > { %s2586_s14 = scalar_lea.hbm %s3524_s13, 256  ;;  %s2590_s30 = scalar_lea.hbm %s3575_s6, 512 }
 0x449   : > { %p2587_p11 = scmp.ne.s32.totalorder %s3524_s13, %s2586_s14  ;;  %p2591_p0 = scmp.lt.u32.totalorder %s3524_s13, %s3575_s6 }
 0x44a   : > { %p2592_p2 = scmp.lt.u32.totalorder %s2590_s30, %s2586_s14  ;;  %p2594_p10 = scmp.lt.u32.totalorder %s2586_s14, %s3524_s13 }
 0x44b   : > { %p2588_p13 = pnand %p2587_p11, %p2855_p1 }
 0x44c   : > { %p2593_p6 = por %p2592_p2, %p2591_p0 }
 0x44d   : > { %p2589_p12 = pneg %p2588_p13 }
 0x44e   : > { %p2595_p5 = por %p2594_p10, %p2593_p6 }
 0x450   : > { %p2596_p9 = pnand %p2595_p5, %p2589_p12 }
 0x452   : > { %2599 = shalt.err (!%p2596_p9)
}
 0x453   : > { %s2670_s10 = smov 128   ;;  %s2671_s1 = smov 8  }
 0x454   : > { %2202 = dma.vmem_to_hbm [thread:$0]  (%p2855_p1), %s3519_s26, 256, %s3524_s13, %s1904_s15, %s2670_s10, %s2670_s10, %s2671_s1  }
 0x455 PF: > { %s1932_s12 = sand.u32 1, %s2638_s21   ;;  %p3657_p4 = scmp.ne.s32.totalorder %s3600_s28, 0 }
 0x456   : > { %p3658_p8 = scmp.ge.s32.totalorder %s2650_s24, 2  ;;  %s1933_s7 = scalar_lea.sflag [#allocation4], %s1932_s12 }
 0x458   : > { %p2222_p3 = pnand %p3658_p8, %p3657_p4 }
 0x45a   : > { %2633 = dma.done.wait (!%p2222_p3), %s1933_s7, 256  }
 0x45b   : > { %2635 = vsyncadd (!%p2222_p3), %s1933_s7, 4294967040  ;;  %p22_p7 = scmp.ge.s32.totalorder %s2842_s16, 4   ;;  %s3659_s21 = smov %s2642_s22 }
 0x45c   : > { %s3660_s22 = smov %s2646_s23  ;;  %s3661_s23 = smov %s2851_s8 }
 0x45d   : > { %s3662_s24 = smov %s2842_s16  ;;  %24 = sbr.rel (!%p22_p7) target bundleno = 10 (0xa), region = 121 }
 0x464   :  { %1938 = vsyncpa [#allocation3], 1 }
 0x465   :  { %1940 = vsyncpa [#allocation3 + $0x1], 1 }
 0x466   :  { %1941 = vsyncpa [#allocation7], 1 }
 0x467   :  { %1942 = vsyncpa [#allocation10], 1 }
 0x468   :  { %1943 = vsyncpa [#allocation4], 1 }
 0x469   :  { %1945 = vsyncpa [#allocation4 + $0x1], 1 }
 0x46a   :  { %1946 = vsyncpa [#allocation5], 1 }
 0x46b   :  { %1948 = vsyncpa [#allocation5 + $0x1], 1 }

</bundles_post_ra>
